<compile_context>
chip_gen: v5e
topology: v5e:2x2
jax: 0.10.0
libtpu: 0.0.40
codegen_flags: <defaults>
</compile_context>

<pallas_src>
import functools

import jax
import jax.numpy as jnp
from jax import lax
from jax.experimental import pallas as pl
from jax.experimental.pallas import tpu as pltpu

# ----------------------------- model config ---------------------------------
HIDDEN = 32
NUM_HEADS = 4
HEAD_DIM = HIDDEN // NUM_HEADS
FF_DIM = 64
EPS = 1e-5


# ----------------------------- fused kernel ----------------------------------
def decoder_layer_kernel(trg_ref, src_ref, tmask_ref, smask_ref,
                         ln_ref,
                         sa_wqkv_ref, sa_bqkv_ref, sa_wo_ref, sa_bo_ref,
                         ca_wq_ref, ca_bq_ref, ca_wkv_ref, ca_bkv_ref,
                         ca_wo_ref, ca_bo_ref,
                         ff_w1_ref, ff_b1_ref, ff_w2_ref, ff_b2_ref,
                         o_ref,
                         ctx_ref,                      # VMEM scratch (Tq, D) f32
                         *, num_heads, head_dim):
    D = num_heads * head_dim
    bf16 = jnp.bfloat16
    f32 = jnp.float32

    def layer_norm(x, row):
        # ln_ref rows: [g1, b1, g2, b2, g3, b3]
        g = ln_ref[row:row + 1, :]
        b = ln_ref[row + 1:row + 2, :]
        mu = jnp.mean(x, axis=-1, keepdims=True)
        var = jnp.mean((x - mu) ** 2, axis=-1, keepdims=True)
        return (x - mu) * lax.rsqrt(var + EPS) * g + b

    def attend(q, k, v, mask, wo_ref, bo_ref):
        # q: (Tq, D) f32; k, v: (Tk, D) f32; mask: (Tq, Tk) additive f32
        scale = 1.0 / (head_dim ** 0.5)
        for h in range(num_heads):                     # static unroll
            sl = slice(h * head_dim, (h + 1) * head_dim)
            qh = q[:, sl].astype(bf16)
            kh = k[:, sl].astype(bf16)
            vh = v[:, sl].astype(bf16)
            # scores = qh @ kh.T  (contract last dims; bf16 MXU, f32 acc)
            s = lax.dot_general(qh, kh, (((1,), (1,)), ((), ())),
                                preferred_element_type=f32) * scale + mask
            m = jnp.max(s, axis=-1, keepdims=True)
            p = jnp.exp(s - m)                         # unnormalized probs, f32
            denom = jnp.sum(p, axis=-1, keepdims=True)
            ctx_h = jnp.dot(p.astype(bf16), vh, preferred_element_type=f32)
            # deferred normalization on the small (Tq, head_dim) context
            ctx_ref[:, sl] = ctx_h * pl.reciprocal(denom, approx=True)
        ctx = ctx_ref[...].astype(bf16)                # (Tq, D)
        return jnp.dot(ctx, wo_ref[...], preferred_element_type=f32) + bo_ref[...]

    x0 = trg_ref[0]                                    # (Tq, D) f32
    srcx = src_ref[0]                                  # (Ts, D) f32

    # ---- block 1: LN1 + self-attention + residual (residual = LN'd input)
    x1 = layer_norm(x0, 0)
    qkv = jnp.dot(x1.astype(bf16), sa_wqkv_ref[...],
                  preferred_element_type=f32) + sa_bqkv_ref[...]   # (Tq, 3D)
    t1 = x1 + attend(qkv[:, :D], qkv[:, D:2 * D], qkv[:, 2 * D:],
                     tmask_ref[0], sa_wo_ref, sa_bo_ref)

    # ---- block 2: LN2 + cross-attention + residual
    x2 = layer_norm(t1, 2)
    q2 = jnp.dot(x2.astype(bf16), ca_wq_ref[...],
                 preferred_element_type=f32) + ca_bq_ref[...]      # (Tq, D)
    kv2 = jnp.dot(srcx.astype(bf16), ca_wkv_ref[...],
                  preferred_element_type=f32) + ca_bkv_ref[...]    # (Ts, 2D)
    t2 = x2 + attend(q2, kv2[:, :D], kv2[:, D:],
                     smask_ref[0], ca_wo_ref, ca_bo_ref)

    # ---- block 3: LN3 + feed-forward + residual
    x3 = layer_norm(t2, 4)
    h = jnp.dot(x3.astype(bf16), ff_w1_ref[...],
                preferred_element_type=f32) + ff_b1_ref[...]       # (Tq, Dff)
    h = jnp.maximum(h, 0.0)
    y = jnp.dot(h.astype(bf16), ff_w2_ref[...],
                preferred_element_type=f32) + ff_b2_ref[...]       # (Tq, D)
    o_ref[0] = x3 + y


# ----------------------------- wrapper ----------------------------------------
def transformer_decoder_layer(src, src_mask, trg, trg_mask, p):
    """Matches TransformerDecoderLayer.forward (dropout = identity, eval mode)."""
    B, Tq, D = trg.shape
    Ts = src.shape[1]
    Dff = p["ff_w1"].shape[1]
    bf16 = jnp.bfloat16

    # Parameter packing / bf16 weight casts (one-time, outside the kernel).
    ln = jnp.stack([p["ln1_g"], p["ln1_b"], p["ln2_g"], p["ln2_b"],
                    p["ln3_g"], p["ln3_b"]], axis=0)                      # (6, D)
    sa_wqkv = jnp.concatenate([p["sa_wq"], p["sa_wk"], p["sa_wv"]], 1).astype(bf16)
    sa_bqkv = jnp.concatenate([p["sa_bq"], p["sa_bk"], p["sa_bv"]], 0).reshape(1, 3 * D)
    sa_wo = p["sa_wo"].astype(bf16)
    sa_bo = p["sa_bo"].reshape(1, D)
    ca_wq = p["ca_wq"].astype(bf16)
    ca_bq = p["ca_bq"].reshape(1, D)
    ca_wkv = jnp.concatenate([p["ca_wk"], p["ca_wv"]], 1).astype(bf16)
    ca_bkv = jnp.concatenate([p["ca_bk"], p["ca_bv"]], 0).reshape(1, 2 * D)
    ca_wo = p["ca_wo"].astype(bf16)
    ca_bo = p["ca_bo"].reshape(1, D)
    ff_w1 = p["ff_w1"].astype(bf16)
    ff_b1 = p["ff_b1"].reshape(1, Dff)
    ff_w2 = p["ff_w2"].astype(bf16)
    ff_b2 = p["ff_b2"].reshape(1, D)

    kern = functools.partial(decoder_layer_kernel,
                             num_heads=NUM_HEADS, head_dim=HEAD_DIM)

    def full(shape):
        n = len(shape)
        return pl.BlockSpec(shape, lambda b, _n=n: (0,) * _n)

    return pl.pallas_call(
        kern,
        out_shape=jax.ShapeDtypeStruct((B, Tq, D), trg.dtype),
        grid=(B,),
        in_specs=[
            pl.BlockSpec((1, Tq, D), lambda b: (b, 0, 0)),    # trg
            pl.BlockSpec((1, Ts, D), lambda b: (b, 0, 0)),    # src
            pl.BlockSpec((1, Tq, Tq), lambda b: (b, 0, 0)),   # trg_mask
            pl.BlockSpec((1, Tq, Ts), lambda b: (b, 0, 0)),   # src_mask
            full((6, D)),                                     # LN params
            full((D, 3 * D)), full((1, 3 * D)),               # sa qkv
            full((D, D)), full((1, D)),                       # sa out proj
            full((D, D)), full((1, D)),                       # ca q
            full((D, 2 * D)), full((1, 2 * D)),               # ca kv
            full((D, D)), full((1, D)),                       # ca out proj
            full((D, Dff)), full((1, Dff)),                   # ff w1
            full((Dff, D)), full((1, D)),                     # ff w2
        ],
        out_specs=pl.BlockSpec((1, Tq, D), lambda b: (b, 0, 0)),
        scratch_shapes=[pltpu.VMEM((Tq, D), jnp.float32)],
        compiler_params=pltpu.CompilerParams(dimension_semantics=("parallel",)),
    )(trg, src, trg_mask, src_mask,
      ln, sa_wqkv, sa_bqkv, sa_wo, sa_bo,
      ca_wq, ca_bq, ca_wkv, ca_bkv, ca_wo, ca_bo,
      ff_w1, ff_b1, ff_w2, ff_b2)


# ----------------------------- pure-JAX reference -----------------------------
def reference_forward(src, src_mask, trg, trg_mask, p, mm_dtype=jnp.float32):
    """Reference forward. mm_dtype=jnp.bfloat16 emulates the kernel's bf16 MXU
    operands (f32 accumulation) for a tight numerical comparison."""
    f32 = jnp.float32

    def mm(a, b):
        return jnp.matmul(a.astype(mm_dtype), b.astype(mm_dtype),
                          preferred_element_type=f32)

    def em(spec, a, b):
        return jnp.einsum(spec, a.astype(mm_dtype), b.astype(mm_dtype),
                          preferred_element_type=f32)

    def ln(x, g, b):
        mu = x.mean(-1, keepdims=True)
        var = ((x - mu) ** 2).mean(-1, keepdims=True)
        return (x - mu) / jnp.sqrt(var + EPS) * g + b

    def mha(q_in, kv, mask, wq, bq, wk, bk, wv, bv, wo, bo):
        B, Tq, D = q_in.shape
        Tk = kv.shape[1]
        q = mm(q_in, wq) + bq
        k = mm(kv, wk) + bk
        v = mm(kv, wv) + bv
        sh = lambda x, T: x.reshape(B, T, NUM_HEADS, HEAD_DIM).transpose(0, 2, 1, 3)
        qh, kh, vh = sh(q, Tq), sh(k, Tk), sh(v, Tk)
        s = em("bhqd,bhkd->bhqk", qh, kh) / (HEAD_DIM ** 0.5) + mask[:, None]
        a = jax.nn.softmax(s, axis=-1)
        c = em("bhqk,bhkd->bhqd", a, vh).transpose(0, 2, 1, 3).reshape(B, Tq, D)
        return q_in + mm(c, wo) + bo

    t = ln(trg, p["ln1_g"], p["ln1_b"])
    t = mha(t, t, trg_mask,
            p["sa_wq"], p["sa_bq"], p["sa_wk"], p["sa_bk"],
            p["sa_wv"], p["sa_bv"], p["sa_wo"], p["sa_bo"])
    t = ln(t, p["ln2_g"], p["ln2_b"])
    t = mha(t, src, src_mask,
            p["ca_wq"], p["ca_bq"], p["ca_wk"], p["ca_bk"],
            p["ca_wv"], p["ca_bv"], p["ca_wo"], p["ca_bo"])
    t = ln(t, p["ln3_g"], p["ln3_b"])
    h = jnp.maximum(mm(t, p["ff_w1"]) + p["ff_b1"], 0.0)
    t = t + mm(h, p["ff_w2"]) + p["ff_b2"]
    return t


# ----------------------------- main -------------------------------------------
if __name__ == "__main__":
    B, T_TRG, S_SRC = 2, 8, 8
    key = jax.random.PRNGKey(0)
    keys = jax.random.split(key, 40)
    ki = iter(range(40))

    def nrm(shape, scale=0.05):
        return (scale * jax.random.normal(keys[next(ki)], shape)).astype(jnp.float32)

    params = {
        # non-trivial LN affine params so LN indexing bugs are detectable
        "ln1_g": 1.0 + nrm((HIDDEN,), 0.1), "ln1_b": nrm((HIDDEN,), 0.05),
        "ln2_g": 1.0 + nrm((HIDDEN,), 0.1), "ln2_b": nrm((HIDDEN,), 0.05),
        "ln3_g": 1.0 + nrm((HIDDEN,), 0.1), "ln3_b": nrm((HIDDEN,), 0.05),
        "sa_wq": nrm((HIDDEN, HIDDEN)), "sa_bq": nrm((HIDDEN,)),
        "sa_wk": nrm((HIDDEN, HIDDEN)), "sa_bk": nrm((HIDDEN,)),
        "sa_wv": nrm((HIDDEN, HIDDEN)), "sa_bv": nrm((HIDDEN,)),
        "sa_wo": nrm((HIDDEN, HIDDEN)), "sa_bo": nrm((HIDDEN,)),
        "ca_wq": nrm((HIDDEN, HIDDEN)), "ca_bq": nrm((HIDDEN,)),
        "ca_wk": nrm((HIDDEN, HIDDEN)), "ca_bk": nrm((HIDDEN,)),
        "ca_wv": nrm((HIDDEN, HIDDEN)), "ca_bv": nrm((HIDDEN,)),
        "ca_wo": nrm((HIDDEN, HIDDEN)), "ca_bo": nrm((HIDDEN,)),
        "ff_w1": nrm((HIDDEN, FF_DIM)), "ff_b1": nrm((FF_DIM,)),
        "ff_w2": nrm((FF_DIM, HIDDEN)), "ff_b2": nrm((HIDDEN,)),
    }

    src = nrm((B, S_SRC, HIDDEN), scale=1.0)
    trg = nrm((B, T_TRG, HIDDEN), scale=1.0)

    # trg_mask: causal additive mask (B, T, T); src_mask: no masking (B, T, S)
    causal = jnp.where(
        jnp.arange(T_TRG)[:, None] >= jnp.arange(T_TRG)[None, :], 0.0, -1e9
    ).astype(jnp.float32)
    trg_mask = jnp.broadcast_to(causal, (B, T_TRG, T_TRG))
    src_mask = jnp.zeros((B, T_TRG, S_SRC), jnp.float32)

    out = transformer_decoder_layer(src, src_mask, trg, trg_mask, params)
    out = jax.block_until_ready(out)
    assert out.shape == (B, T_TRG, HIDDEN)

    ref_bf16 = reference_forward(src, src_mask, trg, trg_mask, params,
                                 mm_dtype=jnp.bfloat16)
    ref_f32 = reference_forward(src, src_mask, trg, trg_mask, params,
                                mm_dtype=jnp.float32)
    assert jnp.allclose(out, ref_bf16, rtol=5e-3, atol=5e-3), \
        "mismatch vs bf16-emulating reference"
    assert jnp.allclose(out, ref_f32, rtol=5e-2, atol=5e-2), \
        "mismatch vs f32 reference"

    print("KERNEL_OK")
</pallas_src>

<mosaic_0001>
module attributes {stable_mosaic.version = 11 : i64} {
  func.func @decoder_layer_kernel(%arg0: i32, %arg1: memref<1x8x32xf32, #tpu.memory_space<vmem>>, %arg2: memref<1x8x32xf32, #tpu.memory_space<vmem>>, %arg3: memref<1x8x8xf32, #tpu.memory_space<vmem>>, %arg4: memref<1x8x8xf32, #tpu.memory_space<vmem>>, %arg5: memref<6x32xf32, #tpu.memory_space<vmem>>, %arg6: memref<32x96xbf16, #tpu.memory_space<vmem>>, %arg7: memref<1x96xf32, #tpu.memory_space<vmem>>, %arg8: memref<32x32xbf16, #tpu.memory_space<vmem>>, %arg9: memref<1x32xf32, #tpu.memory_space<vmem>>, %arg10: memref<32x32xbf16, #tpu.memory_space<vmem>>, %arg11: memref<1x32xf32, #tpu.memory_space<vmem>>, %arg12: memref<32x64xbf16, #tpu.memory_space<vmem>>, %arg13: memref<1x64xf32, #tpu.memory_space<vmem>>, %arg14: memref<32x32xbf16, #tpu.memory_space<vmem>>, %arg15: memref<1x32xf32, #tpu.memory_space<vmem>>, %arg16: memref<32x64xbf16, #tpu.memory_space<vmem>>, %arg17: memref<1x64xf32, #tpu.memory_space<vmem>>, %arg18: memref<64x32xbf16, #tpu.memory_space<vmem>>, %arg19: memref<1x32xf32, #tpu.memory_space<vmem>>, %arg20: memref<1x8x32xf32, #tpu.memory_space<vmem>>, %arg21: memref<8x32xf32, #tpu.memory_space<vmem>>) attributes {dimension_semantics = [#tpu.dimension_semantics<parallel>], iteration_bounds = array<i64: 2>, scalar_prefetch = 0 : i64, scratch_operands = 1 : i64, tpu.core_type = #tpu.core_type<tc>, window_params = [{transform_indices = @transform_0, window_bounds = array<i64: 1, 8, 32>}, {transform_indices = @transform_1, window_bounds = array<i64: 1, 8, 32>}, {transform_indices = @transform_2, window_bounds = array<i64: 1, 8, 8>}, {transform_indices = @transform_3, window_bounds = array<i64: 1, 8, 8>}, {pipeline_mode = #tpu.pipeline_mode<synchronous>, transform_indices = @transform_4, window_bounds = array<i64: 6, 32>}, {pipeline_mode = #tpu.pipeline_mode<synchronous>, transform_indices = @transform_5, window_bounds = array<i64: 32, 96>}, {pipeline_mode = #tpu.pipeline_mode<synchronous>, transform_indices = @transform_6, window_bounds = array<i64: 1, 96>}, {pipeline_mode = #tpu.pipeline_mode<synchronous>, transform_indices = @transform_7, window_bounds = array<i64: 32, 32>}, {pipeline_mode = #tpu.pipeline_mode<synchronous>, transform_indices = @transform_8, window_bounds = array<i64: 1, 32>}, {pipeline_mode = #tpu.pipeline_mode<synchronous>, transform_indices = @transform_9, window_bounds = array<i64: 32, 32>}, {pipeline_mode = #tpu.pipeline_mode<synchronous>, transform_indices = @transform_10, window_bounds = array<i64: 1, 32>}, {pipeline_mode = #tpu.pipeline_mode<synchronous>, transform_indices = @transform_11, window_bounds = array<i64: 32, 64>}, {pipeline_mode = #tpu.pipeline_mode<synchronous>, transform_indices = @transform_12, window_bounds = array<i64: 1, 64>}, {pipeline_mode = #tpu.pipeline_mode<synchronous>, transform_indices = @transform_13, window_bounds = array<i64: 32, 32>}, {pipeline_mode = #tpu.pipeline_mode<synchronous>, transform_indices = @transform_14, window_bounds = array<i64: 1, 32>}, {pipeline_mode = #tpu.pipeline_mode<synchronous>, transform_indices = @transform_15, window_bounds = array<i64: 32, 64>}, {pipeline_mode = #tpu.pipeline_mode<synchronous>, transform_indices = @transform_16, window_bounds = array<i64: 1, 64>}, {pipeline_mode = #tpu.pipeline_mode<synchronous>, transform_indices = @transform_17, window_bounds = array<i64: 64, 32>}, {pipeline_mode = #tpu.pipeline_mode<synchronous>, transform_indices = @transform_18, window_bounds = array<i64: 1, 32>}, {transform_indices = @transform_19, window_bounds = array<i64: 1, 8, 32>}]} {
    %c0 = arith.constant 0 : index
    %c0_0 = arith.constant 0 : index
    %c0_1 = arith.constant 0 : index
    %0 = vector.load %arg1[%c0, %c0_0, %c0_1] : memref<1x8x32xf32, #tpu.memory_space<vmem>>, vector<1x8x32xf32>
    %1 = vector.shape_cast %0 : vector<1x8x32xf32> to vector<8x32xf32>
    %c0_2 = arith.constant 0 : index
    %c0_3 = arith.constant 0 : index
    %c0_4 = arith.constant 0 : index
    %2 = vector.load %arg2[%c0_2, %c0_3, %c0_4] : memref<1x8x32xf32, #tpu.memory_space<vmem>>, vector<1x8x32xf32>
    %3 = vector.shape_cast %2 : vector<1x8x32xf32> to vector<8x32xf32>
    %c0_5 = arith.constant 0 : index
    %c0_6 = arith.constant 0 : index
    %4 = vector.load %arg5[%c0_5, %c0_6] : memref<6x32xf32, #tpu.memory_space<vmem>>, vector<1x32xf32>
    %c1 = arith.constant 1 : index
    %c0_7 = arith.constant 0 : index
    %5 = vector.load %arg5[%c1, %c0_7] : memref<6x32xf32, #tpu.memory_space<vmem>>, vector<1x32xf32>
    %cst = arith.constant dense<0.000000e+00> : vector<8xf32>
    %6 = vector.multi_reduction <add>, %1, %cst [1] : vector<8x32xf32> to vector<8xf32>
    %7 = vector.shape_cast %6 : vector<8xf32> to vector<8x1xf32>
    %cst_8 = arith.constant 3.200000e+01 : f32
    %8 = vector.broadcast %cst_8 : f32 to vector<8x1xf32>
    %9 = arith.divf %7, %8 : vector<8x1xf32>
    %10 = vector.broadcast %9 : vector<8x1xf32> to vector<8x32xf32>
    %11 = arith.subf %1, %10 : vector<8x32xf32>
    %12 = arith.mulf %11, %11 : vector<8x32xf32>
    %cst_9 = arith.constant dense<0.000000e+00> : vector<8xf32>
    %13 = vector.multi_reduction <add>, %12, %cst_9 [1] : vector<8x32xf32> to vector<8xf32>
    %14 = vector.shape_cast %13 : vector<8xf32> to vector<8x1xf32>
    %cst_10 = arith.constant 3.200000e+01 : f32
    %15 = vector.broadcast %cst_10 : f32 to vector<8x1xf32>
    %16 = arith.divf %14, %15 : vector<8x1xf32>
    %17 = vector.broadcast %9 : vector<8x1xf32> to vector<8x32xf32>
    %18 = arith.subf %1, %17 : vector<8x32xf32>
    %cst_11 = arith.constant 9.99999974E-6 : f32
    %19 = vector.broadcast %cst_11 : f32 to vector<8x1xf32>
    %20 = arith.addf %16, %19 : vector<8x1xf32>
    %21 = math.rsqrt %20 : vector<8x1xf32>
    %22 = vector.broadcast %21 : vector<8x1xf32> to vector<8x32xf32>
    %23 = arith.mulf %18, %22 : vector<8x32xf32>
    %24 = vector.broadcast %4 : vector<1x32xf32> to vector<8x32xf32>
    %25 = arith.mulf %23, %24 : vector<8x32xf32>
    %26 = vector.broadcast %5 : vector<1x32xf32> to vector<8x32xf32>
    %27 = arith.addf %25, %26 : vector<8x32xf32>
    %28 = arith.truncf %27 : vector<8x32xf32> to vector<8x32xbf16>
    %c0_12 = arith.constant 0 : index
    %c0_13 = arith.constant 0 : index
    %29 = vector.load %arg6[%c0_12, %c0_13] : memref<32x96xbf16, #tpu.memory_space<vmem>>, vector<32x96xbf16>
    %cst_14 = arith.constant dense<0.000000e+00> : vector<8x96xf32>
    %30 = tpu.matmul %28, %29, %cst_14 {dimension_numbers = #tpu.dot_dimension_numbers<[1], [0], [0], [1], [0, 0, 1, 1], [], []>} : vector<8x32xbf16>, vector<32x96xbf16>, vector<8x96xf32> -> vector<8x96xf32>
    %c0_15 = arith.constant 0 : index
    %c0_16 = arith.constant 0 : index
    %31 = vector.load %arg7[%c0_15, %c0_16] : memref<1x96xf32, #tpu.memory_space<vmem>>, vector<1x96xf32>
    %32 = vector.broadcast %31 : vector<1x96xf32> to vector<8x96xf32>
    %33 = arith.addf %30, %32 : vector<8x96xf32>
    %34 = vector.extract_strided_slice %33 {offsets = [0, 0], sizes = [8, 32], strides = [1, 1]} : vector<8x96xf32> to vector<8x32xf32>
    %35 = vector.extract_strided_slice %33 {offsets = [0, 32], sizes = [8, 32], strides = [1, 1]} : vector<8x96xf32> to vector<8x32xf32>
    %36 = vector.extract_strided_slice %33 {offsets = [0, 64], sizes = [8, 32], strides = [1, 1]} : vector<8x96xf32> to vector<8x32xf32>
    %c0_17 = arith.constant 0 : index
    %c0_18 = arith.constant 0 : index
    %c0_19 = arith.constant 0 : index
    %37 = vector.load %arg3[%c0_17, %c0_18, %c0_19] : memref<1x8x8xf32, #tpu.memory_space<vmem>>, vector<1x8x8xf32>
    %38 = vector.shape_cast %37 : vector<1x8x8xf32> to vector<8x8xf32>
    %39 = vector.extract_strided_slice %34 {offsets = [0, 0], sizes = [8, 8], strides = [1, 1]} : vector<8x32xf32> to vector<8x8xf32>
    %40 = arith.truncf %39 : vector<8x8xf32> to vector<8x8xbf16>
    %41 = vector.extract_strided_slice %35 {offsets = [0, 0], sizes = [8, 8], strides = [1, 1]} : vector<8x32xf32> to vector<8x8xf32>
    %42 = arith.truncf %41 : vector<8x8xf32> to vector<8x8xbf16>
    %43 = vector.extract_strided_slice %36 {offsets = [0, 0], sizes = [8, 8], strides = [1, 1]} : vector<8x32xf32> to vector<8x8xf32>
    %44 = arith.truncf %43 : vector<8x8xf32> to vector<8x8xbf16>
    %cst_20 = arith.constant dense<0.000000e+00> : vector<8x8xf32>
    %45 = tpu.matmul %40, %42, %cst_20 {dimension_numbers = #tpu.dot_dimension_numbers<[1], [1], [0], [0], [0, 0, 1, 0], [], []>} : vector<8x8xbf16>, vector<8x8xbf16>, vector<8x8xf32> -> vector<8x8xf32>
    %cst_21 = arith.constant 0.353553385 : f32
    %46 = vector.broadcast %cst_21 : f32 to vector<8x8xf32>
    %47 = arith.mulf %45, %46 : vector<8x8xf32>
    %48 = arith.addf %47, %38 : vector<8x8xf32>
    %cst_22 = arith.constant dense<0xFF800000> : vector<8xf32>
    %49 = vector.multi_reduction <maximumf>, %48, %cst_22 [1] : vector<8x8xf32> to vector<8xf32>
    %50 = vector.shape_cast %49 : vector<8xf32> to vector<8x1xf32>
    %51 = vector.broadcast %50 : vector<8x1xf32> to vector<8x8xf32>
    %52 = arith.subf %48, %51 : vector<8x8xf32>
    %53 = math.exp %52 : vector<8x8xf32>
    %cst_23 = arith.constant dense<0.000000e+00> : vector<8xf32>
    %54 = vector.multi_reduction <add>, %53, %cst_23 [1] : vector<8x8xf32> to vector<8xf32>
    %55 = vector.shape_cast %54 : vector<8xf32> to vector<8x1xf32>
    %56 = arith.truncf %53 : vector<8x8xf32> to vector<8x8xbf16>
    %cst_24 = arith.constant dense<0.000000e+00> : vector<8x8xf32>
    %57 = tpu.matmul %56, %44, %cst_24 {dimension_numbers = #tpu.dot_dimension_numbers<[1], [0], [0], [1], [0, 0, 1, 1], [], []>} : vector<8x8xbf16>, vector<8x8xbf16>, vector<8x8xf32> -> vector<8x8xf32>
    %58 = tpu.reciprocal %55 {approx = true} : vector<8x1xf32> -> vector<8x1xf32>
    %59 = vector.broadcast %58 : vector<8x1xf32> to vector<8x8xf32>
    %60 = arith.mulf %57, %59 : vector<8x8xf32>
    %c0_25 = arith.constant 0 : index
    %c0_26 = arith.constant 0 : index
    %61 = vector.load %arg21[%c0_25, %c0_26] : memref<8x32xf32, #tpu.memory_space<vmem>>, vector<8x8xf32>
    tpu.vector_store %arg21[%c0_25, %c0_26], %60 {strides = array<i32>} : memref<8x32xf32, #tpu.memory_space<vmem>>, vector<8x8xf32>,
    %62 = vector.extract_strided_slice %34 {offsets = [0, 8], sizes = [8, 8], strides = [1, 1]} : vector<8x32xf32> to vector<8x8xf32>
    %63 = arith.truncf %62 : vector<8x8xf32> to vector<8x8xbf16>
    %64 = vector.extract_strided_slice %35 {offsets = [0, 8], sizes = [8, 8], strides = [1, 1]} : vector<8x32xf32> to vector<8x8xf32>
    %65 = arith.truncf %64 : vector<8x8xf32> to vector<8x8xbf16>
    %66 = vector.extract_strided_slice %36 {offsets = [0, 8], sizes = [8, 8], strides = [1, 1]} : vector<8x32xf32> to vector<8x8xf32>
    %67 = arith.truncf %66 : vector<8x8xf32> to vector<8x8xbf16>
    %cst_27 = arith.constant dense<0.000000e+00> : vector<8x8xf32>
    %68 = tpu.matmul %63, %65, %cst_27 {dimension_numbers = #tpu.dot_dimension_numbers<[1], [1], [0], [0], [0, 0, 1, 0], [], []>} : vector<8x8xbf16>, vector<8x8xbf16>, vector<8x8xf32> -> vector<8x8xf32>
    %cst_28 = arith.constant 0.353553385 : f32
    %69 = vector.broadcast %cst_28 : f32 to vector<8x8xf32>
    %70 = arith.mulf %68, %69 : vector<8x8xf32>
    %71 = arith.addf %70, %38 : vector<8x8xf32>
    %cst_29 = arith.constant dense<0xFF800000> : vector<8xf32>
    %72 = vector.multi_reduction <maximumf>, %71, %cst_29 [1] : vector<8x8xf32> to vector<8xf32>
    %73 = vector.shape_cast %72 : vector<8xf32> to vector<8x1xf32>
    %74 = vector.broadcast %73 : vector<8x1xf32> to vector<8x8xf32>
    %75 = arith.subf %71, %74 : vector<8x8xf32>
    %76 = math.exp %75 : vector<8x8xf32>
    %cst_30 = arith.constant dense<0.000000e+00> : vector<8xf32>
    %77 = vector.multi_reduction <add>, %76, %cst_30 [1] : vector<8x8xf32> to vector<8xf32>
    %78 = vector.shape_cast %77 : vector<8xf32> to vector<8x1xf32>
    %79 = arith.truncf %76 : vector<8x8xf32> to vector<8x8xbf16>
    %cst_31 = arith.constant dense<0.000000e+00> : vector<8x8xf32>
    %80 = tpu.matmul %79, %67, %cst_31 {dimension_numbers = #tpu.dot_dimension_numbers<[1], [0], [0], [1], [0, 0, 1, 1], [], []>} : vector<8x8xbf16>, vector<8x8xbf16>, vector<8x8xf32> -> vector<8x8xf32>
    %81 = tpu.reciprocal %78 {approx = true} : vector<8x1xf32> -> vector<8x1xf32>
    %82 = vector.broadcast %81 : vector<8x1xf32> to vector<8x8xf32>
    %83 = arith.mulf %80, %82 : vector<8x8xf32>
    %c0_32 = arith.constant 0 : index
    %c8 = arith.constant 8 : index
    %84 = vector.load %arg21[%c0_32, %c8] : memref<8x32xf32, #tpu.memory_space<vmem>>, vector<8x8xf32>
    tpu.vector_store %arg21[%c0_32, %c8], %83 {strides = array<i32>} : memref<8x32xf32, #tpu.memory_space<vmem>>, vector<8x8xf32>,
    %85 = vector.extract_strided_slice %34 {offsets = [0, 16], sizes = [8, 8], strides = [1, 1]} : vector<8x32xf32> to vector<8x8xf32>
    %86 = arith.truncf %85 : vector<8x8xf32> to vector<8x8xbf16>
    %87 = vector.extract_strided_slice %35 {offsets = [0, 16], sizes = [8, 8], strides = [1, 1]} : vector<8x32xf32> to vector<8x8xf32>
    %88 = arith.truncf %87 : vector<8x8xf32> to vector<8x8xbf16>
    %89 = vector.extract_strided_slice %36 {offsets = [0, 16], sizes = [8, 8], strides = [1, 1]} : vector<8x32xf32> to vector<8x8xf32>
    %90 = arith.truncf %89 : vector<8x8xf32> to vector<8x8xbf16>
    %cst_33 = arith.constant dense<0.000000e+00> : vector<8x8xf32>
    %91 = tpu.matmul %86, %88, %cst_33 {dimension_numbers = #tpu.dot_dimension_numbers<[1], [1], [0], [0], [0, 0, 1, 0], [], []>} : vector<8x8xbf16>, vector<8x8xbf16>, vector<8x8xf32> -> vector<8x8xf32>
    %cst_34 = arith.constant 0.353553385 : f32
    %92 = vector.broadcast %cst_34 : f32 to vector<8x8xf32>
    %93 = arith.mulf %91, %92 : vector<8x8xf32>
    %94 = arith.addf %93, %38 : vector<8x8xf32>
    %cst_35 = arith.constant dense<0xFF800000> : vector<8xf32>
    %95 = vector.multi_reduction <maximumf>, %94, %cst_35 [1] : vector<8x8xf32> to vector<8xf32>
    %96 = vector.shape_cast %95 : vector<8xf32> to vector<8x1xf32>
    %97 = vector.broadcast %96 : vector<8x1xf32> to vector<8x8xf32>
    %98 = arith.subf %94, %97 : vector<8x8xf32>
    %99 = math.exp %98 : vector<8x8xf32>
    %cst_36 = arith.constant dense<0.000000e+00> : vector<8xf32>
    %100 = vector.multi_reduction <add>, %99, %cst_36 [1] : vector<8x8xf32> to vector<8xf32>
    %101 = vector.shape_cast %100 : vector<8xf32> to vector<8x1xf32>
    %102 = arith.truncf %99 : vector<8x8xf32> to vector<8x8xbf16>
    %cst_37 = arith.constant dense<0.000000e+00> : vector<8x8xf32>
    %103 = tpu.matmul %102, %90, %cst_37 {dimension_numbers = #tpu.dot_dimension_numbers<[1], [0], [0], [1], [0, 0, 1, 1], [], []>} : vector<8x8xbf16>, vector<8x8xbf16>, vector<8x8xf32> -> vector<8x8xf32>
    %104 = tpu.reciprocal %101 {approx = true} : vector<8x1xf32> -> vector<8x1xf32>
    %105 = vector.broadcast %104 : vector<8x1xf32> to vector<8x8xf32>
    %106 = arith.mulf %103, %105 : vector<8x8xf32>
    %c0_38 = arith.constant 0 : index
    %c16 = arith.constant 16 : index
    %107 = vector.load %arg21[%c0_38, %c16] : memref<8x32xf32, #tpu.memory_space<vmem>>, vector<8x8xf32>
    tpu.vector_store %arg21[%c0_38, %c16], %106 {strides = array<i32>} : memref<8x32xf32, #tpu.memory_space<vmem>>, vector<8x8xf32>,
    %108 = vector.extract_strided_slice %34 {offsets = [0, 24], sizes = [8, 8], strides = [1, 1]} : vector<8x32xf32> to vector<8x8xf32>
    %109 = arith.truncf %108 : vector<8x8xf32> to vector<8x8xbf16>
    %110 = vector.extract_strided_slice %35 {offsets = [0, 24], sizes = [8, 8], strides = [1, 1]} : vector<8x32xf32> to vector<8x8xf32>
    %111 = arith.truncf %110 : vector<8x8xf32> to vector<8x8xbf16>
    %112 = vector.extract_strided_slice %36 {offsets = [0, 24], sizes = [8, 8], strides = [1, 1]} : vector<8x32xf32> to vector<8x8xf32>
    %113 = arith.truncf %112 : vector<8x8xf32> to vector<8x8xbf16>
    %cst_39 = arith.constant dense<0.000000e+00> : vector<8x8xf32>
    %114 = tpu.matmul %109, %111, %cst_39 {dimension_numbers = #tpu.dot_dimension_numbers<[1], [1], [0], [0], [0, 0, 1, 0], [], []>} : vector<8x8xbf16>, vector<8x8xbf16>, vector<8x8xf32> -> vector<8x8xf32>
    %cst_40 = arith.constant 0.353553385 : f32
    %115 = vector.broadcast %cst_40 : f32 to vector<8x8xf32>
    %116 = arith.mulf %114, %115 : vector<8x8xf32>
    %117 = arith.addf %116, %38 : vector<8x8xf32>
    %cst_41 = arith.constant dense<0xFF800000> : vector<8xf32>
    %118 = vector.multi_reduction <maximumf>, %117, %cst_41 [1] : vector<8x8xf32> to vector<8xf32>
    %119 = vector.shape_cast %118 : vector<8xf32> to vector<8x1xf32>
    %120 = vector.broadcast %119 : vector<8x1xf32> to vector<8x8xf32>
    %121 = arith.subf %117, %120 : vector<8x8xf32>
    %122 = math.exp %121 : vector<8x8xf32>
    %cst_42 = arith.constant dense<0.000000e+00> : vector<8xf32>
    %123 = vector.multi_reduction <add>, %122, %cst_42 [1] : vector<8x8xf32> to vector<8xf32>
    %124 = vector.shape_cast %123 : vector<8xf32> to vector<8x1xf32>
    %125 = arith.truncf %122 : vector<8x8xf32> to vector<8x8xbf16>
    %cst_43 = arith.constant dense<0.000000e+00> : vector<8x8xf32>
    %126 = tpu.matmul %125, %113, %cst_43 {dimension_numbers = #tpu.dot_dimension_numbers<[1], [0], [0], [1], [0, 0, 1, 1], [], []>} : vector<8x8xbf16>, vector<8x8xbf16>, vector<8x8xf32> -> vector<8x8xf32>
    %127 = tpu.reciprocal %124 {approx = true} : vector<8x1xf32> -> vector<8x1xf32>
    %128 = vector.broadcast %127 : vector<8x1xf32> to vector<8x8xf32>
    %129 = arith.mulf %126, %128 : vector<8x8xf32>
    %c0_44 = arith.constant 0 : index
    %c24 = arith.constant 24 : index
    %130 = vector.load %arg21[%c0_44, %c24] : memref<8x32xf32, #tpu.memory_space<vmem>>, vector<8x8xf32>
    tpu.vector_store %arg21[%c0_44, %c24], %129 {strides = array<i32>} : memref<8x32xf32, #tpu.memory_space<vmem>>, vector<8x8xf32>,
    %c0_45 = arith.constant 0 : index
    %c0_46 = arith.constant 0 : index
    %131 = vector.load %arg21[%c0_45, %c0_46] : memref<8x32xf32, #tpu.memory_space<vmem>>, vector<8x32xf32>
    %132 = arith.truncf %131 : vector<8x32xf32> to vector<8x32xbf16>
    %c0_47 = arith.constant 0 : index
    %c0_48 = arith.constant 0 : index
    %133 = vector.load %arg8[%c0_47, %c0_48] : memref<32x32xbf16, #tpu.memory_space<vmem>>, vector<32x32xbf16>
    %cst_49 = arith.constant dense<0.000000e+00> : vector<8x32xf32>
    %134 = tpu.matmul %132, %133, %cst_49 {dimension_numbers = #tpu.dot_dimension_numbers<[1], [0], [0], [1], [0, 0, 1, 1], [], []>} : vector<8x32xbf16>, vector<32x32xbf16>, vector<8x32xf32> -> vector<8x32xf32>
    %c0_50 = arith.constant 0 : index
    %c0_51 = arith.constant 0 : index
    %135 = vector.load %arg9[%c0_50, %c0_51] : memref<1x32xf32, #tpu.memory_space<vmem>>, vector<1x32xf32>
    %136 = vector.broadcast %135 : vector<1x32xf32> to vector<8x32xf32>
    %137 = arith.addf %134, %136 : vector<8x32xf32>
    %138 = arith.addf %27, %137 : vector<8x32xf32>
    %c2 = arith.constant 2 : index
    %c0_52 = arith.constant 0 : index
    %139 = vector.load %arg5[%c2, %c0_52] : memref<6x32xf32, #tpu.memory_space<vmem>>, vector<1x32xf32>
    %c3 = arith.constant 3 : index
    %c0_53 = arith.constant 0 : index
    %140 = vector.load %arg5[%c3, %c0_53] : memref<6x32xf32, #tpu.memory_space<vmem>>, vector<1x32xf32>
    %cst_54 = arith.constant dense<0.000000e+00> : vector<8xf32>
    %141 = vector.multi_reduction <add>, %138, %cst_54 [1] : vector<8x32xf32> to vector<8xf32>
    %142 = vector.shape_cast %141 : vector<8xf32> to vector<8x1xf32>
    %cst_55 = arith.constant 3.200000e+01 : f32
    %143 = vector.broadcast %cst_55 : f32 to vector<8x1xf32>
    %144 = arith.divf %142, %143 : vector<8x1xf32>
    %145 = vector.broadcast %144 : vector<8x1xf32> to vector<8x32xf32>
    %146 = arith.subf %138, %145 : vector<8x32xf32>
    %147 = arith.mulf %146, %146 : vector<8x32xf32>
    %cst_56 = arith.constant dense<0.000000e+00> : vector<8xf32>
    %148 = vector.multi_reduction <add>, %147, %cst_56 [1] : vector<8x32xf32> to vector<8xf32>
    %149 = vector.shape_cast %148 : vector<8xf32> to vector<8x1xf32>
    %cst_57 = arith.constant 3.200000e+01 : f32
    %150 = vector.broadcast %cst_57 : f32 to vector<8x1xf32>
    %151 = arith.divf %149, %150 : vector<8x1xf32>
    %152 = vector.broadcast %144 : vector<8x1xf32> to vector<8x32xf32>
    %153 = arith.subf %138, %152 : vector<8x32xf32>
    %cst_58 = arith.constant 9.99999974E-6 : f32
    %154 = vector.broadcast %cst_58 : f32 to vector<8x1xf32>
    %155 = arith.addf %151, %154 : vector<8x1xf32>
    %156 = math.rsqrt %155 : vector<8x1xf32>
    %157 = vector.broadcast %156 : vector<8x1xf32> to vector<8x32xf32>
    %158 = arith.mulf %153, %157 : vector<8x32xf32>
    %159 = vector.broadcast %139 : vector<1x32xf32> to vector<8x32xf32>
    %160 = arith.mulf %158, %159 : vector<8x32xf32>
    %161 = vector.broadcast %140 : vector<1x32xf32> to vector<8x32xf32>
    %162 = arith.addf %160, %161 : vector<8x32xf32>
    %163 = arith.truncf %162 : vector<8x32xf32> to vector<8x32xbf16>
    %c0_59 = arith.constant 0 : index
    %c0_60 = arith.constant 0 : index
    %164 = vector.load %arg10[%c0_59, %c0_60] : memref<32x32xbf16, #tpu.memory_space<vmem>>, vector<32x32xbf16>
    %cst_61 = arith.constant dense<0.000000e+00> : vector<8x32xf32>
    %165 = tpu.matmul %163, %164, %cst_61 {dimension_numbers = #tpu.dot_dimension_numbers<[1], [0], [0], [1], [0, 0, 1, 1], [], []>} : vector<8x32xbf16>, vector<32x32xbf16>, vector<8x32xf32> -> vector<8x32xf32>
    %c0_62 = arith.constant 0 : index
    %c0_63 = arith.constant 0 : index
    %166 = vector.load %arg11[%c0_62, %c0_63] : memref<1x32xf32, #tpu.memory_space<vmem>>, vector<1x32xf32>
    %167 = vector.broadcast %166 : vector<1x32xf32> to vector<8x32xf32>
    %168 = arith.addf %165, %167 : vector<8x32xf32>
    %169 = arith.truncf %3 : vector<8x32xf32> to vector<8x32xbf16>
    %c0_64 = arith.constant 0 : index
    %c0_65 = arith.constant 0 : index
    %170 = vector.load %arg12[%c0_64, %c0_65] : memref<32x64xbf16, #tpu.memory_space<vmem>>, vector<32x64xbf16>
    %cst_66 = arith.constant dense<0.000000e+00> : vector<8x64xf32>
    %171 = tpu.matmul %169, %170, %cst_66 {dimension_numbers = #tpu.dot_dimension_numbers<[1], [0], [0], [1], [0, 0, 1, 1], [], []>} : vector<8x32xbf16>, vector<32x64xbf16>, vector<8x64xf32> -> vector<8x64xf32>
    %c0_67 = arith.constant 0 : index
    %c0_68 = arith.constant 0 : index
    %172 = vector.load %arg13[%c0_67, %c0_68] : memref<1x64xf32, #tpu.memory_space<vmem>>, vector<1x64xf32>
    %173 = vector.broadcast %172 : vector<1x64xf32> to vector<8x64xf32>
    %174 = arith.addf %171, %173 : vector<8x64xf32>
    %175 = vector.extract_strided_slice %174 {offsets = [0, 0], sizes = [8, 32], strides = [1, 1]} : vector<8x64xf32> to vector<8x32xf32>
    %176 = vector.extract_strided_slice %174 {offsets = [0, 32], sizes = [8, 32], strides = [1, 1]} : vector<8x64xf32> to vector<8x32xf32>
    %c0_69 = arith.constant 0 : index
    %c0_70 = arith.constant 0 : index
    %c0_71 = arith.constant 0 : index
    %177 = vector.load %arg4[%c0_69, %c0_70, %c0_71] : memref<1x8x8xf32, #tpu.memory_space<vmem>>, vector<1x8x8xf32>
    %178 = vector.shape_cast %177 : vector<1x8x8xf32> to vector<8x8xf32>
    %179 = vector.extract_strided_slice %168 {offsets = [0, 0], sizes = [8, 8], strides = [1, 1]} : vector<8x32xf32> to vector<8x8xf32>
    %180 = arith.truncf %179 : vector<8x8xf32> to vector<8x8xbf16>
    %181 = vector.extract_strided_slice %175 {offsets = [0, 0], sizes = [8, 8], strides = [1, 1]} : vector<8x32xf32> to vector<8x8xf32>
    %182 = arith.truncf %181 : vector<8x8xf32> to vector<8x8xbf16>
    %183 = vector.extract_strided_slice %176 {offsets = [0, 0], sizes = [8, 8], strides = [1, 1]} : vector<8x32xf32> to vector<8x8xf32>
    %184 = arith.truncf %183 : vector<8x8xf32> to vector<8x8xbf16>
    %cst_72 = arith.constant dense<0.000000e+00> : vector<8x8xf32>
    %185 = tpu.matmul %180, %182, %cst_72 {dimension_numbers = #tpu.dot_dimension_numbers<[1], [1], [0], [0], [0, 0, 1, 0], [], []>} : vector<8x8xbf16>, vector<8x8xbf16>, vector<8x8xf32> -> vector<8x8xf32>
    %cst_73 = arith.constant 0.353553385 : f32
    %186 = vector.broadcast %cst_73 : f32 to vector<8x8xf32>
    %187 = arith.mulf %185, %186 : vector<8x8xf32>
    %188 = arith.addf %187, %178 : vector<8x8xf32>
    %cst_74 = arith.constant dense<0xFF800000> : vector<8xf32>
    %189 = vector.multi_reduction <maximumf>, %188, %cst_74 [1] : vector<8x8xf32> to vector<8xf32>
    %190 = vector.shape_cast %189 : vector<8xf32> to vector<8x1xf32>
    %191 = vector.broadcast %190 : vector<8x1xf32> to vector<8x8xf32>
    %192 = arith.subf %188, %191 : vector<8x8xf32>
    %193 = math.exp %192 : vector<8x8xf32>
    %cst_75 = arith.constant dense<0.000000e+00> : vector<8xf32>
    %194 = vector.multi_reduction <add>, %193, %cst_75 [1] : vector<8x8xf32> to vector<8xf32>
    %195 = vector.shape_cast %194 : vector<8xf32> to vector<8x1xf32>
    %196 = arith.truncf %193 : vector<8x8xf32> to vector<8x8xbf16>
    %cst_76 = arith.constant dense<0.000000e+00> : vector<8x8xf32>
    %197 = tpu.matmul %196, %184, %cst_76 {dimension_numbers = #tpu.dot_dimension_numbers<[1], [0], [0], [1], [0, 0, 1, 1], [], []>} : vector<8x8xbf16>, vector<8x8xbf16>, vector<8x8xf32> -> vector<8x8xf32>
    %198 = tpu.reciprocal %195 {approx = true} : vector<8x1xf32> -> vector<8x1xf32>
    %199 = vector.broadcast %198 : vector<8x1xf32> to vector<8x8xf32>
    %200 = arith.mulf %197, %199 : vector<8x8xf32>
    %c0_77 = arith.constant 0 : index
    %c0_78 = arith.constant 0 : index
    %201 = vector.load %arg21[%c0_77, %c0_78] : memref<8x32xf32, #tpu.memory_space<vmem>>, vector<8x8xf32>
    tpu.vector_store %arg21[%c0_77, %c0_78], %200 {strides = array<i32>} : memref<8x32xf32, #tpu.memory_space<vmem>>, vector<8x8xf32>,
    %202 = vector.extract_strided_slice %168 {offsets = [0, 8], sizes = [8, 8], strides = [1, 1]} : vector<8x32xf32> to vector<8x8xf32>
    %203 = arith.truncf %202 : vector<8x8xf32> to vector<8x8xbf16>
    %204 = vector.extract_strided_slice %175 {offsets = [0, 8], sizes = [8, 8], strides = [1, 1]} : vector<8x32xf32> to vector<8x8xf32>
    %205 = arith.truncf %204 : vector<8x8xf32> to vector<8x8xbf16>
    %206 = vector.extract_strided_slice %176 {offsets = [0, 8], sizes = [8, 8], strides = [1, 1]} : vector<8x32xf32> to vector<8x8xf32>
    %207 = arith.truncf %206 : vector<8x8xf32> to vector<8x8xbf16>
    %cst_79 = arith.constant dense<0.000000e+00> : vector<8x8xf32>
    %208 = tpu.matmul %203, %205, %cst_79 {dimension_numbers = #tpu.dot_dimension_numbers<[1], [1], [0], [0], [0, 0, 1, 0], [], []>} : vector<8x8xbf16>, vector<8x8xbf16>, vector<8x8xf32> -> vector<8x8xf32>
    %cst_80 = arith.constant 0.353553385 : f32
    %209 = vector.broadcast %cst_80 : f32 to vector<8x8xf32>
    %210 = arith.mulf %208, %209 : vector<8x8xf32>
    %211 = arith.addf %210, %178 : vector<8x8xf32>
    %cst_81 = arith.constant dense<0xFF800000> : vector<8xf32>
    %212 = vector.multi_reduction <maximumf>, %211, %cst_81 [1] : vector<8x8xf32> to vector<8xf32>
    %213 = vector.shape_cast %212 : vector<8xf32> to vector<8x1xf32>
    %214 = vector.broadcast %213 : vector<8x1xf32> to vector<8x8xf32>
    %215 = arith.subf %211, %214 : vector<8x8xf32>
    %216 = math.exp %215 : vector<8x8xf32>
    %cst_82 = arith.constant dense<0.000000e+00> : vector<8xf32>
    %217 = vector.multi_reduction <add>, %216, %cst_82 [1] : vector<8x8xf32> to vector<8xf32>
    %218 = vector.shape_cast %217 : vector<8xf32> to vector<8x1xf32>
    %219 = arith.truncf %216 : vector<8x8xf32> to vector<8x8xbf16>
    %cst_83 = arith.constant dense<0.000000e+00> : vector<8x8xf32>
    %220 = tpu.matmul %219, %207, %cst_83 {dimension_numbers = #tpu.dot_dimension_numbers<[1], [0], [0], [1], [0, 0, 1, 1], [], []>} : vector<8x8xbf16>, vector<8x8xbf16>, vector<8x8xf32> -> vector<8x8xf32>
    %221 = tpu.reciprocal %218 {approx = true} : vector<8x1xf32> -> vector<8x1xf32>
    %222 = vector.broadcast %221 : vector<8x1xf32> to vector<8x8xf32>
    %223 = arith.mulf %220, %222 : vector<8x8xf32>
    %c0_84 = arith.constant 0 : index
    %c8_85 = arith.constant 8 : index
    %224 = vector.load %arg21[%c0_84, %c8_85] : memref<8x32xf32, #tpu.memory_space<vmem>>, vector<8x8xf32>
    tpu.vector_store %arg21[%c0_84, %c8_85], %223 {strides = array<i32>} : memref<8x32xf32, #tpu.memory_space<vmem>>, vector<8x8xf32>,
    %225 = vector.extract_strided_slice %168 {offsets = [0, 16], sizes = [8, 8], strides = [1, 1]} : vector<8x32xf32> to vector<8x8xf32>
    %226 = arith.truncf %225 : vector<8x8xf32> to vector<8x8xbf16>
    %227 = vector.extract_strided_slice %175 {offsets = [0, 16], sizes = [8, 8], strides = [1, 1]} : vector<8x32xf32> to vector<8x8xf32>
    %228 = arith.truncf %227 : vector<8x8xf32> to vector<8x8xbf16>
    %229 = vector.extract_strided_slice %176 {offsets = [0, 16], sizes = [8, 8], strides = [1, 1]} : vector<8x32xf32> to vector<8x8xf32>
    %230 = arith.truncf %229 : vector<8x8xf32> to vector<8x8xbf16>
    %cst_86 = arith.constant dense<0.000000e+00> : vector<8x8xf32>
    %231 = tpu.matmul %226, %228, %cst_86 {dimension_numbers = #tpu.dot_dimension_numbers<[1], [1], [0], [0], [0, 0, 1, 0], [], []>} : vector<8x8xbf16>, vector<8x8xbf16>, vector<8x8xf32> -> vector<8x8xf32>
    %cst_87 = arith.constant 0.353553385 : f32
    %232 = vector.broadcast %cst_87 : f32 to vector<8x8xf32>
    %233 = arith.mulf %231, %232 : vector<8x8xf32>
    %234 = arith.addf %233, %178 : vector<8x8xf32>
    %cst_88 = arith.constant dense<0xFF800000> : vector<8xf32>
    %235 = vector.multi_reduction <maximumf>, %234, %cst_88 [1] : vector<8x8xf32> to vector<8xf32>
    %236 = vector.shape_cast %235 : vector<8xf32> to vector<8x1xf32>
    %237 = vector.broadcast %236 : vector<8x1xf32> to vector<8x8xf32>
    %238 = arith.subf %234, %237 : vector<8x8xf32>
    %239 = math.exp %238 : vector<8x8xf32>
    %cst_89 = arith.constant dense<0.000000e+00> : vector<8xf32>
    %240 = vector.multi_reduction <add>, %239, %cst_89 [1] : vector<8x8xf32> to vector<8xf32>
    %241 = vector.shape_cast %240 : vector<8xf32> to vector<8x1xf32>
    %242 = arith.truncf %239 : vector<8x8xf32> to vector<8x8xbf16>
    %cst_90 = arith.constant dense<0.000000e+00> : vector<8x8xf32>
    %243 = tpu.matmul %242, %230, %cst_90 {dimension_numbers = #tpu.dot_dimension_numbers<[1], [0], [0], [1], [0, 0, 1, 1], [], []>} : vector<8x8xbf16>, vector<8x8xbf16>, vector<8x8xf32> -> vector<8x8xf32>
    %244 = tpu.reciprocal %241 {approx = true} : vector<8x1xf32> -> vector<8x1xf32>
    %245 = vector.broadcast %244 : vector<8x1xf32> to vector<8x8xf32>
    %246 = arith.mulf %243, %245 : vector<8x8xf32>
    %c0_91 = arith.constant 0 : index
    %c16_92 = arith.constant 16 : index
    %247 = vector.load %arg21[%c0_91, %c16_92] : memref<8x32xf32, #tpu.memory_space<vmem>>, vector<8x8xf32>
    tpu.vector_store %arg21[%c0_91, %c16_92], %246 {strides = array<i32>} : memref<8x32xf32, #tpu.memory_space<vmem>>, vector<8x8xf32>,
    %248 = vector.extract_strided_slice %168 {offsets = [0, 24], sizes = [8, 8], strides = [1, 1]} : vector<8x32xf32> to vector<8x8xf32>
    %249 = arith.truncf %248 : vector<8x8xf32> to vector<8x8xbf16>
    %250 = vector.extract_strided_slice %175 {offsets = [0, 24], sizes = [8, 8], strides = [1, 1]} : vector<8x32xf32> to vector<8x8xf32>
    %251 = arith.truncf %250 : vector<8x8xf32> to vector<8x8xbf16>
    %252 = vector.extract_strided_slice %176 {offsets = [0, 24], sizes = [8, 8], strides = [1, 1]} : vector<8x32xf32> to vector<8x8xf32>
    %253 = arith.truncf %252 : vector<8x8xf32> to vector<8x8xbf16>
    %cst_93 = arith.constant dense<0.000000e+00> : vector<8x8xf32>
    %254 = tpu.matmul %249, %251, %cst_93 {dimension_numbers = #tpu.dot_dimension_numbers<[1], [1], [0], [0], [0, 0, 1, 0], [], []>} : vector<8x8xbf16>, vector<8x8xbf16>, vector<8x8xf32> -> vector<8x8xf32>
    %cst_94 = arith.constant 0.353553385 : f32
    %255 = vector.broadcast %cst_94 : f32 to vector<8x8xf32>
    %256 = arith.mulf %254, %255 : vector<8x8xf32>
    %257 = arith.addf %256, %178 : vector<8x8xf32>
    %cst_95 = arith.constant dense<0xFF800000> : vector<8xf32>
    %258 = vector.multi_reduction <maximumf>, %257, %cst_95 [1] : vector<8x8xf32> to vector<8xf32>
    %259 = vector.shape_cast %258 : vector<8xf32> to vector<8x1xf32>
    %260 = vector.broadcast %259 : vector<8x1xf32> to vector<8x8xf32>
    %261 = arith.subf %257, %260 : vector<8x8xf32>
    %262 = math.exp %261 : vector<8x8xf32>
    %cst_96 = arith.constant dense<0.000000e+00> : vector<8xf32>
    %263 = vector.multi_reduction <add>, %262, %cst_96 [1] : vector<8x8xf32> to vector<8xf32>
    %264 = vector.shape_cast %263 : vector<8xf32> to vector<8x1xf32>
    %265 = arith.truncf %262 : vector<8x8xf32> to vector<8x8xbf16>
    %cst_97 = arith.constant dense<0.000000e+00> : vector<8x8xf32>
    %266 = tpu.matmul %265, %253, %cst_97 {dimension_numbers = #tpu.dot_dimension_numbers<[1], [0], [0], [1], [0, 0, 1, 1], [], []>} : vector<8x8xbf16>, vector<8x8xbf16>, vector<8x8xf32> -> vector<8x8xf32>
    %267 = tpu.reciprocal %264 {approx = true} : vector<8x1xf32> -> vector<8x1xf32>
    %268 = vector.broadcast %267 : vector<8x1xf32> to vector<8x8xf32>
    %269 = arith.mulf %266, %268 : vector<8x8xf32>
    %c0_98 = arith.constant 0 : index
    %c24_99 = arith.constant 24 : index
    %270 = vector.load %arg21[%c0_98, %c24_99] : memref<8x32xf32, #tpu.memory_space<vmem>>, vector<8x8xf32>
    tpu.vector_store %arg21[%c0_98, %c24_99], %269 {strides = array<i32>} : memref<8x32xf32, #tpu.memory_space<vmem>>, vector<8x8xf32>,
    %c0_100 = arith.constant 0 : index
    %c0_101 = arith.constant 0 : index
    %271 = vector.load %arg21[%c0_100, %c0_101] : memref<8x32xf32, #tpu.memory_space<vmem>>, vector<8x32xf32>
    %272 = arith.truncf %271 : vector<8x32xf32> to vector<8x32xbf16>
    %c0_102 = arith.constant 0 : index
    %c0_103 = arith.constant 0 : index
    %273 = vector.load %arg14[%c0_102, %c0_103] : memref<32x32xbf16, #tpu.memory_space<vmem>>, vector<32x32xbf16>
    %cst_104 = arith.constant dense<0.000000e+00> : vector<8x32xf32>
    %274 = tpu.matmul %272, %273, %cst_104 {dimension_numbers = #tpu.dot_dimension_numbers<[1], [0], [0], [1], [0, 0, 1, 1], [], []>} : vector<8x32xbf16>, vector<32x32xbf16>, vector<8x32xf32> -> vector<8x32xf32>
    %c0_105 = arith.constant 0 : index
    %c0_106 = arith.constant 0 : index
    %275 = vector.load %arg15[%c0_105, %c0_106] : memref<1x32xf32, #tpu.memory_space<vmem>>, vector<1x32xf32>
    %276 = vector.broadcast %275 : vector<1x32xf32> to vector<8x32xf32>
    %277 = arith.addf %274, %276 : vector<8x32xf32>
    %278 = arith.addf %162, %277 : vector<8x32xf32>
    %c4 = arith.constant 4 : index
    %c0_107 = arith.constant 0 : index
    %279 = vector.load %arg5[%c4, %c0_107] : memref<6x32xf32, #tpu.memory_space<vmem>>, vector<1x32xf32>
    %c5 = arith.constant 5 : index
    %c0_108 = arith.constant 0 : index
    %280 = vector.load %arg5[%c5, %c0_108] : memref<6x32xf32, #tpu.memory_space<vmem>>, vector<1x32xf32>
    %cst_109 = arith.constant dense<0.000000e+00> : vector<8xf32>
    %281 = vector.multi_reduction <add>, %278, %cst_109 [1] : vector<8x32xf32> to vector<8xf32>
    %282 = vector.shape_cast %281 : vector<8xf32> to vector<8x1xf32>
    %cst_110 = arith.constant 3.200000e+01 : f32
    %283 = vector.broadcast %cst_110 : f32 to vector<8x1xf32>
    %284 = arith.divf %282, %283 : vector<8x1xf32>
    %285 = vector.broadcast %284 : vector<8x1xf32> to vector<8x32xf32>
    %286 = arith.subf %278, %285 : vector<8x32xf32>
    %287 = arith.mulf %286, %286 : vector<8x32xf32>
    %cst_111 = arith.constant dense<0.000000e+00> : vector<8xf32>
    %288 = vector.multi_reduction <add>, %287, %cst_111 [1] : vector<8x32xf32> to vector<8xf32>
    %289 = vector.shape_cast %288 : vector<8xf32> to vector<8x1xf32>
    %cst_112 = arith.constant 3.200000e+01 : f32
    %290 = vector.broadcast %cst_112 : f32 to vector<8x1xf32>
    %291 = arith.divf %289, %290 : vector<8x1xf32>
    %292 = vector.broadcast %284 : vector<8x1xf32> to vector<8x32xf32>
    %293 = arith.subf %278, %292 : vector<8x32xf32>
    %cst_113 = arith.constant 9.99999974E-6 : f32
    %294 = vector.broadcast %cst_113 : f32 to vector<8x1xf32>
    %295 = arith.addf %291, %294 : vector<8x1xf32>
    %296 = math.rsqrt %295 : vector<8x1xf32>
    %297 = vector.broadcast %296 : vector<8x1xf32> to vector<8x32xf32>
    %298 = arith.mulf %293, %297 : vector<8x32xf32>
    %299 = vector.broadcast %279 : vector<1x32xf32> to vector<8x32xf32>
    %300 = arith.mulf %298, %299 : vector<8x32xf32>
    %301 = vector.broadcast %280 : vector<1x32xf32> to vector<8x32xf32>
    %302 = arith.addf %300, %301 : vector<8x32xf32>
    %303 = arith.truncf %302 : vector<8x32xf32> to vector<8x32xbf16>
    %c0_114 = arith.constant 0 : index
    %c0_115 = arith.constant 0 : index
    %304 = vector.load %arg16[%c0_114, %c0_115] : memref<32x64xbf16, #tpu.memory_space<vmem>>, vector<32x64xbf16>
    %cst_116 = arith.constant dense<0.000000e+00> : vector<8x64xf32>
    %305 = tpu.matmul %303, %304, %cst_116 {dimension_numbers = #tpu.dot_dimension_numbers<[1], [0], [0], [1], [0, 0, 1, 1], [], []>} : vector<8x32xbf16>, vector<32x64xbf16>, vector<8x64xf32> -> vector<8x64xf32>
    %c0_117 = arith.constant 0 : index
    %c0_118 = arith.constant 0 : index
    %306 = vector.load %arg17[%c0_117, %c0_118] : memref<1x64xf32, #tpu.memory_space<vmem>>, vector<1x64xf32>
    %307 = vector.broadcast %306 : vector<1x64xf32> to vector<8x64xf32>
    %308 = arith.addf %305, %307 : vector<8x64xf32>
    %cst_119 = arith.constant 0.000000e+00 : f32
    %309 = vector.broadcast %cst_119 : f32 to vector<8x64xf32>
    %310 = arith.maximumf %308, %309 : vector<8x64xf32>
    %311 = arith.truncf %310 : vector<8x64xf32> to vector<8x64xbf16>
    %c0_120 = arith.constant 0 : index
    %c0_121 = arith.constant 0 : index
    %312 = vector.load %arg18[%c0_120, %c0_121] : memref<64x32xbf16, #tpu.memory_space<vmem>>, vector<64x32xbf16>
    %cst_122 = arith.constant dense<0.000000e+00> : vector<8x32xf32>
    %313 = tpu.matmul %311, %312, %cst_122 {dimension_numbers = #tpu.dot_dimension_numbers<[1], [0], [0], [1], [0, 0, 1, 1], [], []>} : vector<8x64xbf16>, vector<64x32xbf16>, vector<8x32xf32> -> vector<8x32xf32>
    %c0_123 = arith.constant 0 : index
    %c0_124 = arith.constant 0 : index
    %314 = vector.load %arg19[%c0_123, %c0_124] : memref<1x32xf32, #tpu.memory_space<vmem>>, vector<1x32xf32>
    %315 = vector.broadcast %314 : vector<1x32xf32> to vector<8x32xf32>
    %316 = arith.addf %313, %315 : vector<8x32xf32>
    %317 = arith.addf %302, %316 : vector<8x32xf32>
    %c0_125 = arith.constant 0 : index
    %c0_126 = arith.constant 0 : index
    %c0_127 = arith.constant 0 : index
    %318 = vector.load %arg20[%c0_125, %c0_126, %c0_127] : memref<1x8x32xf32, #tpu.memory_space<vmem>>, vector<1x8x32xf32>
    %319 = vector.shape_cast %318 : vector<1x8x32xf32> to vector<8x32xf32>
    %320 = vector.shape_cast %317 : vector<8x32xf32> to vector<1x8x32xf32>
    tpu.vector_store %arg20[%c0_125, %c0_126, %c0_127], %320 {strides = array<i32>} : memref<1x8x32xf32, #tpu.memory_space<vmem>>, vector<1x8x32xf32>,
    return
  }
  func.func @transform_0(%arg0: i32) -> (i32, i32, i32) {
    %c0_i32 = arith.constant 0 : i32
    %c0_i32_0 = arith.constant 0 : i32
    %c0_i32_1 = arith.constant 0 : i32
    return %arg0, %c0_i32, %c0_i32_0 : i32, i32, i32
  }
  func.func @transform_1(%arg0: i32) -> (i32, i32, i32) {
    %c0_i32 = arith.constant 0 : i32
    %c0_i32_0 = arith.constant 0 : i32
    %c0_i32_1 = arith.constant 0 : i32
    return %arg0, %c0_i32, %c0_i32_0 : i32, i32, i32
  }
  func.func @transform_2(%arg0: i32) -> (i32, i32, i32) {
    %c0_i32 = arith.constant 0 : i32
    %c0_i32_0 = arith.constant 0 : i32
    %c0_i32_1 = arith.constant 0 : i32
    return %arg0, %c0_i32, %c0_i32_0 : i32, i32, i32
  }
  func.func @transform_3(%arg0: i32) -> (i32, i32, i32) {
    %c0_i32 = arith.constant 0 : i32
    %c0_i32_0 = arith.constant 0 : i32
    %c0_i32_1 = arith.constant 0 : i32
    return %arg0, %c0_i32, %c0_i32_0 : i32, i32, i32
  }
  func.func @transform_4(%arg0: i32) -> (i32, i32) {
    %c0_i32 = arith.constant 0 : i32
    %c0_i32_0 = arith.constant 0 : i32
    %c0_i32_1 = arith.constant 0 : i32
    return %c0_i32, %c0_i32_0 : i32, i32
  }
  func.func @transform_5(%arg0: i32) -> (i32, i32) {
    %c0_i32 = arith.constant 0 : i32
    %c0_i32_0 = arith.constant 0 : i32
    %c0_i32_1 = arith.constant 0 : i32
    return %c0_i32, %c0_i32_0 : i32, i32
  }
  func.func @transform_6(%arg0: i32) -> (i32, i32) {
    %c0_i32 = arith.constant 0 : i32
    %c0_i32_0 = arith.constant 0 : i32
    %c0_i32_1 = arith.constant 0 : i32
    return %c0_i32, %c0_i32_0 : i32, i32
  }
  func.func @transform_7(%arg0: i32) -> (i32, i32) {
    %c0_i32 = arith.constant 0 : i32
    %c0_i32_0 = arith.constant 0 : i32
    %c0_i32_1 = arith.constant 0 : i32
    return %c0_i32, %c0_i32_0 : i32, i32
  }
  func.func @transform_8(%arg0: i32) -> (i32, i32) {
    %c0_i32 = arith.constant 0 : i32
    %c0_i32_0 = arith.constant 0 : i32
    %c0_i32_1 = arith.constant 0 : i32
    return %c0_i32, %c0_i32_0 : i32, i32
  }
  func.func @transform_9(%arg0: i32) -> (i32, i32) {
    %c0_i32 = arith.constant 0 : i32
    %c0_i32_0 = arith.constant 0 : i32
    %c0_i32_1 = arith.constant 0 : i32
    return %c0_i32, %c0_i32_0 : i32, i32
  }
  func.func @transform_10(%arg0: i32) -> (i32, i32) {
    %c0_i32 = arith.constant 0 : i32
    %c0_i32_0 = arith.constant 0 : i32
    %c0_i32_1 = arith.constant 0 : i32
    return %c0_i32, %c0_i32_0 : i32, i32
  }
  func.func @transform_11(%arg0: i32) -> (i32, i32) {
    %c0_i32 = arith.constant 0 : i32
    %c0_i32_0 = arith.constant 0 : i32
    %c0_i32_1 = arith.constant 0 : i32
    return %c0_i32, %c0_i32_0 : i32, i32
  }
  func.func @transform_12(%arg0: i32) -> (i32, i32) {
    %c0_i32 = arith.constant 0 : i32
    %c0_i32_0 = arith.constant 0 : i32
    %c0_i32_1 = arith.constant 0 : i32
    return %c0_i32, %c0_i32_0 : i32, i32
  }
  func.func @transform_13(%arg0: i32) -> (i32, i32) {
    %c0_i32 = arith.constant 0 : i32
    %c0_i32_0 = arith.constant 0 : i32
    %c0_i32_1 = arith.constant 0 : i32
    return %c0_i32, %c0_i32_0 : i32, i32
  }
  func.func @transform_14(%arg0: i32) -> (i32, i32) {
    %c0_i32 = arith.constant 0 : i32
    %c0_i32_0 = arith.constant 0 : i32
    %c0_i32_1 = arith.constant 0 : i32
    return %c0_i32, %c0_i32_0 : i32, i32
  }
  func.func @transform_15(%arg0: i32) -> (i32, i32) {
    %c0_i32 = arith.constant 0 : i32
    %c0_i32_0 = arith.constant 0 : i32
    %c0_i32_1 = arith.constant 0 : i32
    return %c0_i32, %c0_i32_0 : i32, i32
  }
  func.func @transform_16(%arg0: i32) -> (i32, i32) {
    %c0_i32 = arith.constant 0 : i32
    %c0_i32_0 = arith.constant 0 : i32
    %c0_i32_1 = arith.constant 0 : i32
    return %c0_i32, %c0_i32_0 : i32, i32
  }
  func.func @transform_17(%arg0: i32) -> (i32, i32) {
    %c0_i32 = arith.constant 0 : i32
    %c0_i32_0 = arith.constant 0 : i32
    %c0_i32_1 = arith.constant 0 : i32
    return %c0_i32, %c0_i32_0 : i32, i32
  }
  func.func @transform_18(%arg0: i32) -> (i32, i32) {
    %c0_i32 = arith.constant 0 : i32
    %c0_i32_0 = arith.constant 0 : i32
    %c0_i32_1 = arith.constant 0 : i32
    return %c0_i32, %c0_i32_0 : i32, i32
  }
  func.func @transform_19(%arg0: i32) -> (i32, i32, i32) {
    %c0_i32 = arith.constant 0 : i32
    %c0_i32_0 = arith.constant 0 : i32
    %c0_i32_1 = arith.constant 0 : i32
    return %arg0, %c0_i32, %c0_i32_0 : i32, i32, i32
  }
}

</mosaic_0001>

<bundles_post_ra>
// kernel: tpu_custom_call.1
= control target key start
LH: loop header
LB: loop body
LE: loop exit
PB: predicated region body
PF: predicated region fallthrough
CT: control target
= control target key end

     0   :  { %s3452_s0 = inlined_call_operand.vmem [shape: f32[2,8,32], index: 0, kind: input, shape index: {}]   ;;  %s3453_s1 = inlined_call_operand.vmem [shape: f32[2,8,32], index: 1, kind: input, shape index: {}]   ;;  %s3454_s2 = inlined_call_operand.vmem [shape: f32[2,8,8], index: 2, kind: input, shape index: {}]   ;;  %s3455_s3 = inlined_call_operand.hbm [shape: f32[2,8,8], index: 3, kind: input, shape index: {}]   ;;  %s3456_s4 = inlined_call_operand.hbm [shape: f32[6,32], index: 4, kind: input, shape index: {}]   ;;  %s3457_s5 = inlined_call_operand.hbm [shape: bf16[32,96], index: 5, kind: input, shape index: {}]   ;;  %s3458_s6 = inlined_call_operand.hbm [shape: f32[1,96], index: 6, kind: input, shape index: {}]   ;;  %s3459_s7 = inlined_call_operand.hbm [shape: bf16[32,32], index: 7, kind: input, shape index: {}]   ;;  %s3460_s8 = inlined_call_operand.hbm [shape: f32[1,32], index: 8, kind: input, shape index: {}]   ;;  %s3461_s9 = inlined_call_operand.hbm [shape: bf16[32,32], index: 9, kind: input, shape index: {}]   ;;  %s3462_s10 = inlined_call_operand.hbm [shape: f32[1,32], index: 10, kind: input, shape index: {}]   ;;  %s3463_s11 = inlined_call_operand.hbm [shape: bf16[32,64], index: 11, kind: input, shape index: {}]   ;;  %s3464_s12 = inlined_call_operand.hbm [shape: f32[1,64], index: 12, kind: input, shape index: {}]   ;;  %s3465_s13 = inlined_call_operand.hbm [shape: bf16[32,32], index: 13, kind: input, shape index: {}]   ;;  %s3466_s14 = inlined_call_operand.hbm [shape: f32[1,32], index: 14, kind: input, shape index: {}]   ;;  %s3467_s15 = inlined_call_operand.hbm [shape: bf16[32,64], index: 15, kind: input, shape index: {}]   ;;  %s3468_s16 = inlined_call_operand.hbm [shape: f32[1,64], index: 16, kind: input, shape index: {}]   ;;  %s3469_s17 = inlined_call_operand.vmem [shape: bf16[64,32], index: 17, kind: input, shape index: {}]   ;;  %s3470_s18 = inlined_call_operand.vmem [shape: f32[1,32], index: 18, kind: input, shape index: {}]   ;;  %s3471_s19 = inlined_call_operand.hbm [shape: f32[2,8,32], index: 19, kind: output, shape index: {}]  }
   0x1   :  { %3478 = sst [smem:[#allocation36_spill]] %s3452_s0 }
   0x2   :  { %3479 = sst [smem:[#allocation37_spill]] %s3453_s1 }
   0x3   :  { %3480 = sst [smem:[#allocation38_spill]] %s3454_s2 }
   0x4   :  { %3481 = sst [smem:[#allocation39_spill]] %s3455_s3 }
   0x5   :  { %3482 = sst [smem:[#allocation40_spill]] %s3456_s4 }
   0x6   :  { %3483 = sst [smem:[#allocation41_spill]] %s3457_s5 }
   0x7   :  { %3484 = sst [smem:[#allocation42_spill]] %s3458_s6 }
   0x8   :  { %3485 = sst [smem:[#allocation43_spill]] %s3459_s7 }
   0x9   :  { %3486 = sst [smem:[#allocation44_spill]] %s3460_s8 }
   0xa   :  { %3487 = sst [smem:[#allocation45_spill]] %s3461_s9 }
   0xb   :  { %3488 = sst [smem:[#allocation46_spill]] %s3462_s10 }
   0xc   :  { %3489 = sst [smem:[#allocation47_spill]] %s3469_s17 }
   0xd   :  { %3490 = sst [smem:[#allocation48_spill]] %s3470_s18 }
   0xe   :  { %3491 = sst [smem:[#allocation49_spill]] %s3471_s19 }
   0xf   :  { %24 = vsyncpa [#allocation4], 0 }
  0x10   :  { %26 = vsyncpa [#allocation4 + $0x1], 0 }
  0x11   :  { %27 = vsyncpa [#allocation7], 0 }
  0x12   :  { %28 = vsyncpa [#allocation10], 0 }
  0x13   :  { %29 = vsyncpa [#allocation13], 0 }
  0x14   :  { %30 = vsyncpa [#allocation16], 0 }
  0x15   :  { %31 = vsyncpa [#allocation19], 0 }
  0x16   :  { %32 = vsyncpa [#allocation22], 0 }
  0x17   :  { %33 = vsyncpa [#allocation25], 0 }
  0x18   :  { %34 = vsyncpa [#allocation5], 0 }
  0x19   :  { %36 = vsyncpa [#allocation5 + $0x1], 0  ;;  %s3036_s0 = smov 0   ;;  %s3038_s30 = smov 0  }
  0x1a   :  { %s3040_s20 = smov 0   ;;  %s3042_s21 = smov 0  }
  0x1b LB: > { %s3492_s4 = sld [smem:[#allocation40_spill]]  ;;  %s3060_s23 = sadd.s32 4294967295, %s2904_s21   ;;  %s2904_s21 = sphi %s3042_s21, %s3519_s21   ;;  %s2900_s20 = sphi %s3040_s20, %s3518_s20   ;;  %s2896_s30 = sphi %s3038_s30, %s3517_s30   ;;  %s2892_s0 = sphi %s3036_s0, %s3516_s0  }
  0x1c   : > { %p2000_p0 = scmp.ge.s32.totalorder %s2904_s21, 1  ;;  %p141_p1 = scmp.eq.s32.totalorder %s3060_s23, 0 }
  0x1d   : > { %p492_p2 = scmp.lt.s32.totalorder %s2904_s21, 3  ;;  %s2906_s25 = smov [#allocation6]  }
  0x1e   : > { %s506_s3 = sshll.u32 %s2906_s25, 4  ;;  %s3494_s6 = sld [smem:[#allocation42_spill]]  ;;  %s507_s3 = int_to_ptr.vmem [resolvable:$true] %s506_s3 }
  0x1f   : > { %p3065_p3 = pnand %p2000_p0, %p492_p2  ;;  %s2907_s1 = smov [#allocation9]  }
  0x20   : > { %s532_s22 = sshll.u32 %s2907_s1, 4  ;;  %s3496_s8 = sld [smem:[#allocation44_spill]]  ;;  %s533_s22 = int_to_ptr.vmem [resolvable:$true] %s532_s22 }
  0x21   : > { %s504_s2 = sshll.u32 %s3492_s4, 4  ;;  %p2199_p5 = pneg %p3065_p3  ;;  %s505_s2 = int_to_ptr.hbm [resolvable:$true] %s504_s2 }
  0x22   : > { %s3497_s10 = sld [smem:[#allocation46_spill]]  ;;  %s2908_s18 = smov [#allocation12]  }
  0x23   : > { %p3077_p6 = pnand %p2199_p5, %p141_p1  ;;  %s558_s17 = sshll.u32 %s2908_s18, 4  ;;  %s559_s17 = int_to_ptr.vmem [resolvable:$true] %s558_s17 }
  0x24   : > { %s530_s28 = sshll.u32 %s3494_s6, 4  ;;  %s2909_s1 = smov [#allocation15]   ;;  %s531_s28 = int_to_ptr.hbm [resolvable:$true] %s530_s28 }
  0x25   : > { %2202 = dma.hbm_to_vmem [thread:$0]  (!%p3077_p6), %s505_s2, 128, %s507_s3, [#allocation7]  }
  0x26   : > { %s556_s19 = sshll.u32 %s3496_s8, 4  ;;  %s584_s4 = sshll.u32 %s2909_s1, 4  ;;  %s557_s19 = int_to_ptr.hbm [resolvable:$true] %s556_s19  ;;  %s585_s4 = int_to_ptr.vmem [resolvable:$true] %s584_s4 }
  0x27   : > { %2208 = dma.hbm_to_vmem [thread:$0]  (!%p3077_p6), %s531_s28, 16, %s533_s22, [#allocation10]  }
  0x28   : > { %s582_s6 = sshll.u32 %s3497_s10, 4  ;;  %s608_s2 = sshll.u32 %s3464_s12, 4  ;;  %s583_s6 = int_to_ptr.hbm [resolvable:$true] %s582_s6  ;;  %s609_s2 = int_to_ptr.hbm [resolvable:$true] %s608_s2 }
  0x29   : > { %2214 = dma.hbm_to_vmem [thread:$0]  (!%p3077_p6), %s557_s19, 16, %s559_s17, [#allocation13]  }
  0x2a   : > { %2220 = dma.hbm_to_vmem [thread:$0]  (!%p3077_p6), %s583_s6, 16, %s585_s4, [#allocation16]  }
  0x2b   : > { %s634_s22 = sshll.u32 %s3466_s14, 4  ;;  %s2910_s18 = smov [#allocation18]   ;;  %s635_s22 = int_to_ptr.hbm [resolvable:$true] %s634_s22 }
  0x2c   : > { %s610_s26 = sshll.u32 %s2910_s18, 4  ;;  %s2911_s17 = smov [#allocation21]   ;;  %s611_s26 = int_to_ptr.vmem [resolvable:$true] %s610_s26 }
  0x2d   : > { %2226 = dma.hbm_to_vmem [thread:$0]  (!%p3077_p6), %s609_s2, 16, %s611_s26, [#allocation19]  }
  0x2e   : > { %s636_s19 = sshll.u32 %s2911_s17, 4  ;;  %s3498_s5 = sld [smem:[#allocation41_spill]]  ;;  %s637_s19 = int_to_ptr.vmem [resolvable:$true] %s636_s19 }
  0x2f   : > { %2232 = dma.hbm_to_vmem [thread:$0]  (!%p3077_p6), %s635_s22, 16, %s637_s19, [#allocation22]  }
  0x30   : > { %s2912_s6 = smov [#allocation8]   ;;  %s3499_s7 = sld [smem:[#allocation43_spill]] }
  0x31   : > { %s517_s4 = sshll.u32 %s2912_s6, 4  ;;  %s2913_s2 = smov 64   ;;  %s518_s4 = int_to_ptr.vmem [resolvable:$true] %s517_s4 }
  0x32   : > { %s2914_s18 = smov 4   ;;  %s2915_s26 = smov [#allocation11]  }
  0x33   : > { %s543_s17 = sshll.u32 %s2915_s26, 4  ;;  %s3500_s9 = sld [smem:[#allocation45_spill]]  ;;  %s544_s17 = int_to_ptr.vmem [resolvable:$true] %s543_s17 }
  0x34   : > { %s515_s1 = sshll.u32 %s3498_s5, 4  ;;  %s593_s25 = sshll.u32 %s3463_s11, 4  ;;  %s516_s1 = int_to_ptr.hbm [resolvable:$true] %s515_s1  ;;  %s594_s25 = int_to_ptr.hbm [resolvable:$true] %s593_s25 }
  0x35   : > { %2205 = dma.hbm_to_vmem [thread:$0]  (!%p3077_p6), %s516_s1, 256, %s518_s4, [#allocation7], %s2913_s2, %s2913_s2, %s2914_s18  }
  0x36   : > { %s541_s28 = sshll.u32 %s3499_s7, 4  ;;  %s2916_s1 = smov [#allocation14]   ;;  %s542_s28 = int_to_ptr.hbm [resolvable:$true] %s541_s28 }
  0x37   : > { %2211 = dma.hbm_to_vmem [thread:$0]  (!%p3077_p6), %s542_s28, 256, %s544_s17, [#allocation10], %s2913_s2, %s2913_s2, %s2914_s18  }
  0x38   : > { %s569_s4 = sshll.u32 %s2916_s1, 4  ;;  %s2917_s3 = smov [#allocation17]   ;;  %s570_s4 = int_to_ptr.vmem [resolvable:$true] %s569_s4 }
  0x39   : > { %s567_s19 = sshll.u32 %s3500_s9, 4  ;;  %s595_s26 = sshll.u32 %s2917_s3, 4  ;;  %s568_s19 = int_to_ptr.hbm [resolvable:$true] %s567_s19  ;;  %s596_s26 = int_to_ptr.vmem [resolvable:$true] %s595_s26 }
  0x3a   : > { %2217 = dma.hbm_to_vmem [thread:$0]  (!%p3077_p6), %s568_s19, 256, %s570_s4, [#allocation13], %s2913_s2, %s2913_s2, %s2914_s18  }
  0x3b   : > { %s619_s28 = sshll.u32 %s3465_s13, 4  ;;  %s645_s6 = sshll.u32 %s3467_s15, 4  ;;  %s620_s28 = int_to_ptr.hbm [resolvable:$true] %s619_s28  ;;  %s646_s6 = int_to_ptr.hbm [resolvable:$true] %s645_s6 }
  0x3c   : > { %2223 = dma.hbm_to_vmem [thread:$0]  (!%p3077_p6), %s594_s25, 256, %s596_s26, [#allocation16], %s2913_s2, %s2913_s2, %s2914_s18  }
  0x3d   : > { %s2918_s19 = smov [#allocation20]   ;;  %s2919_s25 = smov [#allocation23]  }
  0x3e   : > { %s621_s1 = sshll.u32 %s2918_s19, 4  ;;  %s647_s4 = sshll.u32 %s2919_s25, 4  ;;  %s622_s1 = int_to_ptr.vmem [resolvable:$true] %s621_s1  ;;  %s648_s4 = int_to_ptr.vmem [resolvable:$true] %s647_s4 }
  0x3f   : > { %2229 = dma.hbm_to_vmem [thread:$0]  (!%p3077_p6), %s620_s28, 256, %s622_s1, [#allocation19], %s2913_s2, %s2913_s2, %s2914_s18  }
  0x40   : > { %s660_s8 = sshll.u32 %s3468_s16, 4  ;;  %s2920_s22 = smov [#allocation24]   ;;  %s661_s8 = int_to_ptr.hbm [resolvable:$true] %s660_s8 }
  0x41   : > { %2235 = dma.hbm_to_vmem [thread:$0]  (!%p3077_p6), %s646_s6, 256, %s648_s4, [#allocation22], %s2913_s2, %s2913_s2, %s2914_s18  }
  0x42   : > { %s662_s28 = sshll.u32 %s2920_s22, 4  ;;  %s1999_s17 = sadd.s32 4294967294, %s2904_s21   ;;  %s663_s28 = int_to_ptr.vmem [resolvable:$true] %s662_s28 }
  0x43   : > { %2238 = dma.hbm_to_vmem [thread:$0]  (!%p3077_p6), %s661_s8, 16, %s663_s28, [#allocation25]  }
  0x44   : > { %s3160_s27 = sadd.s32 1, %s2904_s21   ;;  %s127_s19 = sadd.s32 1, %s2900_s20 }
  0x45   : > { %s124_s1 = ssub.s32 %s2904_s21, %s3160_s27  ;;  %p134_p7 = scmp.ne.s32.totalorder %s2900_s20, %s2896_s30 }
  0x46   : > { %p125_p8 = scmp.eq.s32.totalorder %s124_s1, 0  ;;  %p135_p9 = scmp.eq.s32.totalorder %s2904_s21, 0 }
  0x47   : > { %p140_p10 = scmp.ne.s32.totalorder %s2896_s30, %s2892_s0  ;;  %p479_p11 = scmp.eq.s32.totalorder %s3060_s23, 1 }
  0x48   : > { %s3172_s2 = scalar_select %p125_p8, %s2900_s20, %s127_s19  }
  0x49   : > { %p3176_p12 = por %p141_p1, %p140_p10  ;;  %p3180_p13 = por %p479_p11, %p134_p7 }
  0x4a   : > { %p485_p0 = scmp.eq.s32.totalorder %s1999_s17, 1  ;;  %p136_p2 = por %p135_p9, %p134_p7 }
  0x4b   : > { %s700_s6 = sand.u32 1, %s2900_s20   ;;  %p2260_p6 = scmp.lt.s32.totalorder %s2904_s21, 2 }
  0x4c   : > { %p3185_p5 = por %p485_p0, %p140_p10  ;;  %s2015_s4 = sshll.u32 %s700_s6, 3 }
  0x4d   : > { %s2016_s3 = sshll.u32 %s2904_s21, 3  ;;  %s3504_s22 = sld [smem:[#allocation39_spill]] }
  0x4e   : > { %s704_s1 = scalar_lea.vmem [#allocation3], %s2015_s4  ;;  %p3194_p8 = pnand %p2260_p6, %p136_p2 }
  0x4f   : > { %s712_s5 = sshll.u32 %s704_s1, 4  ;;  %s701_s7 = scalar_lea.sflag [#allocation4], %s700_s6  ;;  %s713_s5 = int_to_ptr.vmem [resolvable:$true] %s712_s5 }
  0x50   : > { %p2784_p9 = pneg %p3194_p8 }
  0x53   : > { %s708_s28 = scalar_lea.hbm %s3504_s22, %s2016_s3  ;;  %s2787_s4 = scalar_lea.hbm %s3504_s22, 16 }
  0x54   : > { %s710_s19 = sshll.u32 %s708_s28, 4  ;;  %s711_s19 = int_to_ptr.hbm [resolvable:$true] %s710_s19 }
  0x55   : > { %s2780_s9 = sshra.s32 %s711_s19, 4  ;;  %s2781_s9 = int_to_ptr.hbm [resolvable:$true] %s2780_s9 }
  0x56   : > { %s2782_s10 = scalar_lea.hbm %s2781_s9, 8  ;;  %p2788_p0 = scmp.lt.s32.totalorder %s2781_s9, %s3504_s22 }
  0x57   : > { %p2783_p7 = scmp.ne.s32.totalorder %s2781_s9, %s2782_s10  ;;  %p2789_p2 = scmp.lt.s32.totalorder %s2787_s4, %s2782_s10 }
  0x59   : > { %p2785_p10 = pnand %p2784_p9, %p2783_p7  ;;  %p2790_p6 = por %p2789_p2, %p2788_p0 }
  0x5b   : > { %p2786_p11 = pneg %p2785_p10 }
  0x5d   : > { %p2791_p4 = pnand %p2790_p6, %p2786_p11 }
  0x5f   : > { %2794 = shalt.err (!%p2791_p4)
}
  0x60   : > { %2242 = dma.hbm_to_vmem [thread:$0]  (!%p3194_p8), %s711_s19, 128, %s713_s5, %s701_s7  }
  0x61   : > { %721 = sbr.rel (%p3065_p3) target bundleno = 3081 (0xc09), region = 96  ;;  %s3211_s6 = sand.u32 (!%p3065_p3), 1, %s2896_s30  }
  0x62   : > { %s3475_s1 = sshll.u32 (!%p3065_p3), %s3211_s6, 3  ;;  %s724_s3 = scalar_lea.sflag (!%p3065_p3), [#allocation4], %s3211_s6 }
  0x63   : > { %s3217_s9 = scalar_lea.vmem (!%p3065_p3), [#allocation3], %s3475_s1 }
  0x66   : > { %2855 = dma.done.wait (%p3176_p12), %s724_s3, 128  }
  0x67   : > { %2857 = vsyncadd (%p3176_p12), %s724_s3, 4294967168 }
  0x68   : > { %2859 = dma.done.wait (%p141_p1), [#allocation7], 384  }
  0x69   : > { %2861 = vsyncadd (%p141_p1), [#allocation7], 4294966912 }
  0x6a   : > { %2863 = dma.done.wait (%p141_p1), [#allocation10], 272  }
  0x6b   : > { %2865 = vsyncadd (%p141_p1), [#allocation10], 4294967024 }
  0x6c   : > { %2867 = dma.done.wait (%p141_p1), [#allocation13], 272  }
  0x6d   : > { %2869 = vsyncadd (%p141_p1), [#allocation13], 4294967024 }
  0x6e   : > { %2871 = dma.done.wait (%p141_p1), [#allocation16], 272  }
  0x6f   : > { %2873 = vsyncadd (%p141_p1), [#allocation16], 4294967024 }
  0x70   : > { %2875 = dma.done.wait (%p141_p1), [#allocation19], 272  }
  0x71   : > { %2877 = vsyncadd (%p141_p1), [#allocation19], 4294967024 }
  0x72   : > { %2879 = dma.done.wait (%p141_p1), [#allocation22], 272  }
  0x73   : > { %2881 = vsyncadd (%p141_p1), [#allocation22], 4294967024 }
  0x74   : > { %2883 = dma.done.wait (%p141_p1), [#allocation25], 16  }
  0x75   : > { %2885 = vsyncadd (%p141_p1), [#allocation25], 4294967280  ;;  %p860_p3 = scmp.lt.s32.totalorder %s3060_s23, 1  ;;  %s3506_s29 = sld [smem:[#allocation36_spill]]  ;;  %vm877_vm0 = vcmask 261120   ;;  %v2921_v2 = vmov 32.0  }
  0x76   : > { %2350 = vrcp.f32 %v2921_v2  ;;  %v2128_v14 = vld [vmem:[#allocation8 + $0x8] sm:$0xff]  ;;  %v2127_v15 = vld [vmem:[#allocation8] sm:$0xff]  ;;  %v2337_v25 = vld [vmem:[#allocation6] ss:$0 sm:$0xff]  ;;  %s2922_s17 = smov 104   ;;  %s2923_s26 = smov 120  }
  0x77   : > { %s861_s5 = scalar_select %p860_p3, %s3060_s23, 1  ;;  %941 = vmatpush.bf16.msra.mxu0 %v2128_v14  ;;  %v2338_v28 = vld [vmem:[#allocation6 + $0x1] ss:$0 sm:$0xff]  ;;  %v2339_v32 = vld [vmem:[#allocation9] ss:$0 sm:$0xff]  ;;  %vm990_vm5 = vcmask 1043456  }
  0x78   : > { %s2924_s4 = smov 96   ;;  %s2925_s8 = smov 56   ;;  %vm953_vm6 = vcmask 64512   ;;  %vm1072_vm7 = vcmask 130112   ;;  %vm1136_vm8 = vcmask 195712   ;;  %vm1200_vm9 = vcmask 261312  }
  0x79   : > { %s3253_s7 = sshll.u32 %s861_s5, 3  ;;  %s2926_s28 = smov 72  }
  0x7a   : > { %s2927_s3 = smov 88   ;;  %s2928_s5 = smov 112  }
  0x7b   : > { %s863_s19 = scalar_lea.vmem %s3506_s29, %s3253_s7  ;;  %942 = vmatpush.bf16.msra.mxu0 %v2127_v15  ;;  %s2929_s10 = smov 80  }
  0x7c   : > { %v873_v0 = vld [vmem:[%s863_s19] sm:$0xff]  ;;  %v2351_v3 = vpop.eup %2350  ;;  %s2930_s24 = smov 64   ;;  %s2931_s29 = smov 40  }
  0x7d   : > { %v878_v1 = vsel %vm877_vm0, %v873_v0, 0.0  ;;  %v882_v4 = vmul.f32 32.0, %v2351_v3  ;;  %vm886_vm1 = vweird.f32 %v2351_v3  ;;  %s2932_s19 = smov 48   ;;  %s3509_s1 = smov 16  }
  0x7e   : > { %879 = vadd.xlane.f32.xlu0 %v878_v1 }
  0x7f   : > { %v883_v5 = vsub.f32 1.0, %v882_v4 }
  0x81   : > { %v884_v6 = vmul.f32 %v2351_v3, %v883_v5 }
  0x83   : > { %v885_v7 = vadd.f32 %v2351_v3, %v884_v6 }
  0x85   : > { %v3260_v8 = vsel %vm886_vm1, %v2351_v3, %v885_v7  ;;  %vm1734_vm1 = vcmask 523264  }
  0xf1   : > { %v880_v9 = vpop.xlane.xlu0 %879 }
  0xf2   : > { %v888_v10 = vmul.f32 %v3260_v8, %v880_v9 }
  0xf4   : > { %v889_v11 = vsub.f32 %v873_v0, %v888_v10 }
  0xf6   : > { %v890_v12 = vmul.f32 %v889_v11, %v889_v11 }
  0xf8   : > { %v891_v13 = vsel %vm877_vm0, %v890_v12, 0.0 }
  0xf9   : > { %892 = vadd.xlane.f32.xlu0 %v891_v13 }
 0x16c   : > { %v893_v16 = vpop.xlane.xlu0 %892 }
 0x16d   : > { %v894_v17 = vmul.f32 %v893_v16, %v3260_v8 }
 0x16f   : > { %v895_v18 = vadd.f32 1e-05, %v894_v17 }
 0x171   : > { %2352 = vrsqrt.f32 %v895_v18  ;;  %vm902_vm3 = vweird.f32 %v895_v18 }
 0x177   : > { %v2353_v19 = vpop.eup %2352 }
 0x178   : > { %v897_v20 = vmul.f32 %v2353_v19, %v895_v18  ;;  %vm903_vm2 = vweird.f32 %v2353_v19 }
 0x179   : > { %vm904_vm4 = vmor %vm902_vm3, %vm903_vm2 }
 0x17a   : > { %v898_v21 = vmul.f32 %v2353_v19, %v897_v20 }
 0x17c   : > { %v899_v22 = vmul.f32 0.5, %v898_v21 }
 0x17e   : > { %v900_v23 = vsub.f32 1.5, %v899_v22 }
 0x180   : > { %v901_v24 = vmul.f32 %v2353_v19, %v900_v23 }
 0x182   : > { %v905_v26 = vsel %vm904_vm4, %v2353_v19, %v901_v24 }
 0x183   : > { %v906_v27 = vmul.f32 %v905_v26, %v889_v11 }
 0x185   : > { %v908_v29 = vmul.f32 %v2337_v25, %v906_v27 }
 0x187   : > { %v3265_v30 = vadd.f32 %v2338_v28, %v908_v29 }
 0x189   : > { %v911_v31 = vpack.c.bf16 %v3265_v30, %v3265_v30 }
 0x18b   : > { %2044 = vmatmul.msk.bf16.vlgmr.msra.gmra.mxu0 %vm877_vm0, %v911_v31 }
 0x208   : > { %v944_v33 = vpop.f32.mrf.mxu0 }
 0x209   : > { %v945_v34 = vadd.f32 %v2339_v32, %v944_v33 }
 0x20b   : > { %v3270_v35 = vpack.c.bf16 %v945_v34, %v945_v34 }
 0x20d   : > { %1138 = vrot.lane.b32.xlu0 %v3270_v35, %s2922_s17  ;;  %1010 = vrot.lane.b32.xlu2 %v3270_v35, %s2923_s26 }
 0x20e   : > { %951 = vrot.lane.b32.xlu1 %v3270_v35, %s2924_s4 }
 0x210   : > { %v946_v36 = vpop.f32.mrf.mxu0 }
 0x215   : > { %1045 = vrot.lane.b32.xlu0 %v3270_v35, %s2925_s8  ;;  %1140 = vrot.lane.b32.xlu2 %v3270_v35, %s2926_s28  ;;  %s3507_s8 = sld [smem:[#allocation38_spill]] }
 0x216   : > { %1012 = vrot.lane.b32.xlu1 %v3270_v35, %s2927_s3 }
 0x21d   : > { %1074 = vrot.lane.b32.xlu2 %v3270_v35, %s2928_s5 }
 0x21e   : > { %1076 = vrot.lane.b32.xlu1 %v3270_v35, %s2929_s10 }
 0x225   : > { %985 = vrot.lane.b32.xlu2 %v3270_v35, %s2930_s24  ;;  %s871_s24 = scalar_lea.vmem %s3507_s8, %s3253_s7  ;;  %s3477_s8 = smov 16  }
 0x226   : > { %v948_v53 = vld [vmem:[%s871_s24] sm:$0xff]  ;;  %s2934_s24 = smov 8  }
 0x267   : > { %v1011_v37 = vpop.permute.xlu2 %1010 }
 0x26f   : > { %v1141_v38 = vpop.permute.xlu2 %1140 }
 0x270   : > { %v1146_v49 = vsel %vm953_vm6, %v1141_v38, 0 }
 0x277   : > { %v1075_v39 = vpop.permute.xlu2 %1074 }
 0x27f   : > { %v1139_v40 = vpop.permute.xlu0 %1138  ;;  %v986_v41 = vpop.permute.xlu2 %985 }
 0x280   : > { %v952_v42 = vpop.permute.xlu1 %951  ;;  %v992_v43 = vsel %vm990_vm5, %v986_v41, 0 }
 0x281   : > { %v958_v44 = vsel %vm953_vm6, %v952_v42, 0  ;;  %1001 = vmatpush.bf16.msra.mxu2 %v992_v43 }
 0x282   : > { %967 = vmatpush.bf16.xpose.msra.mxu1 %v958_v44 }
 0x287   : > { %v1046_v45 = vpop.permute.xlu0 %1045 }
 0x288   : > { %v1013_v46 = vpop.permute.xlu1 %1012  ;;  %v1051_v47 = vsel %vm990_vm5, %v1046_v45, 0 }
 0x289   : > { %2045 = vmatmul.msk.bf16.vlgmr.msra.gmra.mxu1 %vm953_vm6, %v3270_v35  ;;  %v1018_v48 = vsel %vm953_vm6, %v1013_v46, 0  ;;  %1060 = vmatpush.bf16.msrb.mxu2 %v1051_v47 }
 0x28a   : > { %1027 = vmatpush.bf16.xpose.msra.mxu3 %v1018_v48 }
 0x290   : > { %v1077_v50 = vpop.permute.xlu1 %1076 }
 0x291   : > { %2047 = vmatmul.msk.bf16.vlgmr.msra.gmra.mxu3 %vm953_vm6, %v1011_v37  ;;  %v1082_v51 = vsel %vm953_vm6, %v1077_v50, 0 }
 0x292   : > { %1155 = vmatpush.bf16.xpose.msrb.mxu3 %v1146_v49  ;;  %1091 = vmatpush.bf16.xpose.msrb.mxu0 %v1082_v51 }
 0x299   : > { %2049 = vmatmul.msk.bf16.vlgmr.msrb.gmra.mxu0 %vm953_vm6, %v1075_v39 }
 0x2a1   : > { %2051 = vmatmul.msk.bf16.vlgmr.msrb.gmra.mxu3 %vm953_vm6, %v1139_v40 }
 0x306   : > { %v969_v52 = vpop.f32.mrf.mxu1 }
 0x307   : > { %v973_v54 = vmul.f32 0.35355338, %v969_v52 }
 0x309   : > { %v974_v55 = vadd.f32 %v973_v54, %v948_v53 }
 0x30b   : > { %v975_v56 = vsel %vm953_vm6, %v974_v55, -inf }
 0x30c   : > { %976 = vmax.xlane.f32.xlu1 %v975_v56 }
 0x30e   : > { %v971_v57 = vpop.f32.mrf.mxu1 }
 0x314   : > { %v1029_v58 = vpop.f32.mrf.mxu3 }
 0x315   : > { %v1033_v59 = vmul.f32 0.35355338, %v1029_v58 }
 0x316   : > { %v1093_v60 = vpop.f32.mrf.mxu0 }
 0x317   : > { %v1097_v61 = vmul.f32 0.35355338, %v1093_v60  ;;  %v1034_v62 = vadd.f32 %v1033_v59, %v948_v53  ;;  %v2130_v59 = vld [vmem:[#allocation11 + $0x8] sm:$0xff]  ;;  %v2129_v60 = vld [vmem:[#allocation11] sm:$0xff] }
 0x318   : > { %1233 = vmatpush.bf16.msra.mxu0 %v2130_v59  ;;  %v1343_v59 = vld [vmem:[%s3217_s9] sm:$0xff]  ;;  %s3510_s9 = smov 24  }
 0x319   : > { %v1035_v63 = vsel %vm953_vm6, %v1034_v62, -inf  ;;  %v1098_v0 = vadd.f32 %v1097_v61, %v948_v53 }
 0x31a   : > { %1036 = vmax.xlane.f32.xlu2 %v1035_v63 }
 0x31b   : > { %v1099_v1 = vsel %vm953_vm6, %v1098_v0, -inf }
 0x31c   : > { %v1031_v2 = vpop.f32.mrf.mxu3  ;;  %1100 = vmax.xlane.f32.xlu1 %v1099_v1  ;;  %1234 = vmatpush.bf16.msra.mxu0 %v2129_v60 }
 0x31d   : > { %v2340_v2 = vld [vmem:[#allocation12] ss:$0 sm:$0xff] }
 0x31e   : > { %v1095_v3 = vpop.f32.mrf.mxu0 }
 0x324   : > { %v1157_v4 = vpop.f32.mrf.mxu3 }
 0x325   : > { %v1161_v5 = vmul.f32 0.35355338, %v1157_v4 }
 0x327   : > { %v1162_v6 = vadd.f32 %v1161_v5, %v948_v53 }
 0x329   : > { %v1163_v7 = vsel %vm953_vm6, %v1162_v6, -inf }
 0x32a   : > { %1164 = vmax.xlane.f32.xlu0 %v1163_v7 }
 0x32c   : > { %v1159_v9 = vpop.f32.mrf.mxu3 }
 0x32d   : > { %v2134_v9 = vld [vmem:[#allocation17 + $0x8] sm:$0xff] }
 0x32e   : > { %1336 = vmatpush.bf16.msra.mxu3 %v2134_v9 }
 0x332   : > { %1173 = vrot.lane.b32.xlu2 %v3270_v35, %s2931_s29  ;;  %s3476_s29 = smov 24  }
 0x335   : > { %1109 = vrot.lane.b32.xlu1 %v3270_v35, %s2932_s19 }
 0x37f   : > { %v977_v10 = vpop.xlane.xlu1 %976 }
 0x380   : > { %v978_v11 = vsub.f32 %v974_v55, %v977_v10 }
 0x382   : > { %v979_v12 = vmul.f32 1.442695, %v978_v11  ;;  %v2133_v11 = vld [vmem:[#allocation17] sm:$0xff] }
 0x383   : > { %1337 = vmatpush.bf16.msra.mxu3 %v2133_v11 }
 0x384   : > { %2354 = vpow2.f32 %v979_v12 }
 0x38a   : > { %v2355_v13 = vpop.eup %2354 }
 0x38b   : > { %v981_v14 = vsel %vm953_vm6, %v2355_v13, 0.0  ;;  %v984_v15 = vpack.c.bf16 %v2355_v13, %v2355_v13 }
 0x38c   : > { %982 = vadd.xlane.f32.xlu1 %v981_v14 }
 0x38d   : > { %v1037_v16 = vpop.xlane.xlu2 %1036  ;;  %2046 = vmatmul.msk.bf16.vlgmr.msra.gmra.mxu2 %vm953_vm6, %v984_v15 }
 0x38e   : > { %v1038_v17 = vsub.f32 %v1034_v62, %v1037_v16 }
 0x38f   : > { %v1101_v18 = vpop.xlane.xlu1 %1100 }
 0x390   : > { %v1039_v19 = vmul.f32 1.442695, %v1038_v17  ;;  %v1102_v20 = vsub.f32 %v1098_v0, %v1101_v18  ;;  %v2132_v17 = vld [vmem:[#allocation14 + $0x8] sm:$0xff]  ;;  %v2131_v18 = vld [vmem:[#allocation14] sm:$0xff] }
 0x392   : > { %2356 = vpow2.f32 %v1039_v19  ;;  %v1103_v21 = vmul.f32 1.442695, %v1102_v20  ;;  %v2343_v19 = vld [vmem:[#allocation18] ss:$0 sm:$0xff] }
 0x394   : > { %2358 = vpow2.f32 %v1103_v21 }
 0x395   : > { %v1174_v22 = vpop.permute.xlu2 %1173 }
 0x396   : > { %v1179_v23 = vsel %vm990_vm5, %v1174_v22, 0 }
 0x397   : > { %1188 = vmatpush.bf16.msra.mxu2 %v1179_v23 }
 0x398   : > { %v2357_v24 = vpop.eup %2356 }
 0x399   : > { %v1044_v27 = vpack.c.bf16 %v2357_v24, %v2357_v24  ;;  %v1041_v32 = vsel %vm953_vm6, %v2357_v24, 0.0 }
 0x39a   : > { %v2359_v25 = vpop.eup %2358 }
 0x39b   : > { %v1105_v26 = vsel %vm953_vm6, %v2359_v25, 0.0  ;;  %v1108_v37 = vpack.c.bf16 %v2359_v25, %v2359_v25 }
 0x39c   : > { %1106 = vadd.xlane.f32.xlu0 %v1105_v26 }
 0x39d   : > { %v1165_v28 = vpop.xlane.xlu0 %1164  ;;  %2048 = vmatmul.msk.bf16.vlgmr.msrb.gmra.mxu2 %vm953_vm6, %v1044_v27 }
 0x39e   : > { %v1166_v29 = vsub.f32 %v1162_v6, %v1165_v28 }
 0x3a0   : > { %v1167_v31 = vmul.f32 1.442695, %v1166_v29 }
 0x3a2   : > { %2360 = vpow2.f32 %v1167_v31 }
 0x3a4   : > { %1042 = vadd.xlane.f32.xlu0 %v1041_v32 }
 0x3a7   : > { %v1110_v33 = vpop.permute.xlu1 %1109 }
 0x3a8   : > { %v2361_v34 = vpop.eup %2360  ;;  %v1115_v35 = vsel %vm990_vm5, %v1110_v33, 0 }
 0x3a9   : > { %1124 = vmatpush.bf16.msrb.mxu1 %v1115_v35  ;;  %v1169_v36 = vsel %vm953_vm6, %v2361_v34, 0.0  ;;  %v1172_v38 = vpack.c.bf16 %v2361_v34, %v2361_v34  ;;  %v2341_v35 = vld [vmem:[#allocation6 + $0x2] ss:$0 sm:$0xff] }
 0x3aa   : > { %1170 = vadd.xlane.f32.xlu2 %v1169_v36 }
 0x3ac   : > { %2050 = vmatmul.msk.bf16.vlgmr.msrb.gmra.mxu1 %vm953_vm6, %v1108_v37  ;;  %v2342_v37 = vld [vmem:[#allocation6 + $0x3] ss:$0 sm:$0xff] }
 0x3ad   : > { %2052 = vmatmul.msk.bf16.vlgmr.msra.gmra.mxu2 %vm953_vm6, %v1172_v38  ;;  %1299 = vmatpush.bf16.msra.mxu1 %v2132_v17 }
 0x3b1   : > { %1300 = vmatpush.bf16.msra.mxu1 %v2131_v18 }
 0x3ff   : > { %v983_v39 = vpop.xlane.xlu1 %982 }
 0x400   : > { %2362 = vrcp.f32 %v983_v39 }
 0x406   : > { %v2363_v40 = vpop.eup %2362 }
 0x40f   : > { %v1107_v44 = vpop.xlane.xlu0 %1106 }
 0x410   : > { %v1003_v41 = vpop.f32.mrf.mxu2  ;;  %2364 = vrcp.f32 %v1107_v44 }
 0x411   : > { %v1008_v42 = vmul.f32 %v2363_v40, %v1003_v41 }
 0x413   : > { %1009 = vst.msk [vmem:[#allocation2] sm:$0xff] %vm953_vm6, %v1008_v42  ;;  %v2344_v42 = vld [vmem:[#allocation15] ss:$0 sm:$0xff] }
 0x416   : > { %v2365_v48 = vpop.eup %2364 }
 0x417   : > { %v1043_v46 = vpop.xlane.xlu0 %1042 }
 0x418   : > { %v1005_v43 = vpop.f32.mrf.mxu2  ;;  %2366 = vrcp.f32 %v1043_v46 }
 0x41d   : > { %v1171_v51 = vpop.xlane.xlu2 %1170 }
 0x41e   : > { %v2367_v53 = vpop.eup %2366  ;;  %2368 = vrcp.f32 %v1171_v51 }
 0x420   : > { %v1062_v45 = vpop.f32.mrf.mxu2 }
 0x421   : > { %v1067_v55 = vmul.f32 %v2367_v53, %v1062_v45 }
 0x424   : > { %v2369_v57 = vpop.eup %2368 }
 0x428   : > { %v1064_v47 = vpop.f32.mrf.mxu2 }
 0x429   : > { %v1126_v49 = vpop.f32.mrf.mxu1 }
 0x42a   : > { %v1131_v50 = vmul.f32 %v2365_v48, %v1126_v49 }
 0x42c   : > { %1133 = vrot.lane.b32.xlu0 %v1131_v50, %s3477_s8 }
 0x430   : > { %v1190_v52 = vpop.f32.mrf.mxu2 }
 0x431   : > { %v1128_v54 = vpop.f32.mrf.mxu1  ;;  %v1195_v58 = vmul.f32 %v2369_v57, %v1190_v52 }
 0x434   : > { %1069 = vrot.lane.b32.xlu0 %v1067_v55, %s2934_s24 }
 0x438   : > { %v1192_v56 = vpop.f32.mrf.mxu2 }
 0x43c   : > { %1197 = vrot.lane.b32.xlu0 %v1195_v58, %s3476_s29  ;;  %s3508_s29 = sld [smem:[#allocation37_spill]] }
 0x442   : > { %s867_s8 = scalar_lea.vmem %s3508_s29, %s3253_s7 }
 0x443   : > { %v874_v10 = vld [vmem:[%s867_s8] sm:$0xff] }
 0x444   : > { %v1306_v12 = vpack.c.bf16 %v874_v10, %v874_v10 }
 0x446   : > { %2079 = vmatmul.msk.bf16.vlgmr.msra.gmra.mxu3 %vm877_vm0, %v1306_v12 }
 0x49e   : > { %v1134_v61 = vpop.permute.xlu0 %1133 }
 0x4a6   : > { %v1070_v62 = vpop.permute.xlu0 %1069 }
 0x4a7   : > { %1073 = vst.msk [vmem:[#allocation2] sm:$0xff] %vm1072_vm7, %v1070_v62 }
 0x4a8   : > { %1137 = vst.msk [vmem:[#allocation2] sm:$0xff] %vm1136_vm8, %v1134_v61 }
 0x4ae   : > { %v1198_v63 = vpop.permute.xlu0 %1197 }
 0x4af   : > { %1201 = vst.msk [vmem:[#allocation2] sm:$0xff] %vm1200_vm9, %v1198_v63 }
 0x4b6   : > { %v1202_v0 = vld [vmem:[#allocation2] sm:$0xff] }
 0x4b7   : > { %v1203_v1 = vpack.c.bf16 %v1202_v0, %v1202_v0 }
 0x4b9   : > { %2061 = vmatmul.msk.bf16.vlgmr.msra.gmra.mxu0 %vm877_vm0, %v1203_v1 }
 0x4c9   : > { %v1339_v20 = vpop.f32.mrf.mxu3 }
 0x4ca   : > { %v1340_v23 = vadd.f32 %v2343_v19, %v1339_v20 }
 0x4cc   : > { %v3337_v25 = vpack.c.bf16 %v1340_v23, %v1340_v23 }
 0x4ce   : > { %1405 = vrot.lane.b32.xlu1 %v3337_v25, %s2923_s26  ;;  %v1350_v26 = vsel %vm953_vm6, %v3337_v25, 0 }
 0x4cf   : > { %1359 = vmatpush.bf16.xpose.msrb.mxu2 %v1350_v26 }
 0x4d1   : > { %v1341_v27 = vpop.f32.mrf.mxu3 }
 0x4d6   : > { %1468 = vrot.lane.b32.xlu1 %v3337_v25, %s2928_s5 }
 0x536   : > { %v1236_v3 = vpop.f32.mrf.mxu0 }
 0x537   : > { %v1237_v4 = vadd.f32 %v2340_v2, %v1236_v3 }
 0x539   : > { %v1240_v5 = vadd.f32 %v1237_v4, %v3265_v30 }
 0x53b   : > { %v1243_v6 = vsel %vm877_vm0, %v1240_v5, 0.0 }
 0x53c   : > { %1244 = vadd.xlane.f32.xlu0 %v1243_v6 }
 0x53e   : > { %v1238_v7 = vpop.f32.mrf.mxu0 }
 0x540   : > { %v1406_v43 = vpop.permute.xlu1 %1405 }
 0x541   : > { %v1411_v44 = vsel %vm953_vm6, %v1406_v43, 0 }
 0x542   : > { %1420 = vmatpush.bf16.xpose.msrb.mxu1 %v1411_v44 }
 0x548   : > { %v1469_v48 = vpop.permute.xlu1 %1468 }
 0x549   : > { %v1474_v49 = vsel %vm953_vm6, %v1469_v48, 0 }
 0x54a   : > { %1483 = vmatpush.bf16.xpose.msra.mxu2 %v1474_v49 }
 0x5af   : > { %v1245_v13 = vpop.xlane.xlu0 %1244 }
 0x5b0   : > { %v1246_v14 = vmul.f32 %v1245_v13, %v3260_v8 }
 0x5b2   : > { %v1247_v30 = vsub.f32 %v1240_v5, %v1246_v14 }
 0x5b4   : > { %v1248_v15 = vmul.f32 %v1247_v30, %v1247_v30 }
 0x5b6   : > { %v1249_v16 = vsel %vm877_vm0, %v1248_v15, 0.0 }
 0x5b7   : > { %1250 = vadd.xlane.f32.xlu2 %v1249_v16 }
 0x62a   : > { %v1251_v21 = vpop.xlane.xlu2 %1250 }
 0x62b   : > { %v1252_v22 = vmul.f32 %v1251_v21, %v3260_v8 }
 0x62d   : > { %v1253_v24 = vadd.f32 1e-05, %v1252_v22 }
 0x62f   : > { %2370 = vrsqrt.f32 %v1253_v24  ;;  %vm1260_vm11 = vweird.f32 %v1253_v24 }
 0x635   : > { %v2371_v28 = vpop.eup %2370 }
 0x636   : > { %v1255_v29 = vmul.f32 %v2371_v28, %v1253_v24  ;;  %vm1261_vm10 = vweird.f32 %v2371_v28 }
 0x637   : > { %vm1262_vm12 = vmor %vm1260_vm11, %vm1261_vm10 }
 0x638   : > { %v1256_v31 = vmul.f32 %v2371_v28, %v1255_v29 }
 0x63a   : > { %v1257_v32 = vmul.f32 0.5, %v1256_v31 }
 0x63c   : > { %v1258_v33 = vsub.f32 1.5, %v1257_v32 }
 0x63e   : > { %v1259_v34 = vmul.f32 %v2371_v28, %v1258_v33 }
 0x640   : > { %v1263_v36 = vsel %vm1262_vm12, %v2371_v28, %v1259_v34 }
 0x641   : > { %v1264_v38 = vmul.f32 %v1263_v36, %v1247_v30 }
 0x643   : > { %v1266_v39 = vmul.f32 %v2341_v35, %v1264_v38 }
 0x645   : > { %v3345_v40 = vadd.f32 %v2342_v37, %v1266_v39 }
 0x647   : > { %v1269_v41 = vpack.c.bf16 %v3345_v40, %v3345_v40 }
 0x649   : > { %2070 = vmatmul.msk.bf16.vlgmr.msra.gmra.mxu1 %vm877_vm0, %v1269_v41 }
 0x6c6   : > { %v1302_v45 = vpop.f32.mrf.mxu1 }
 0x6c7   : > { %v1303_v46 = vadd.f32 %v2344_v42, %v1302_v45 }
 0x6c9   : > { %v1344_v47 = vpack.c.bf16 %v1303_v46, %v1303_v46 }
 0x6cb   : > { %1466 = vrot.lane.b32.xlu1 %v1344_v47, %s2928_s5  ;;  %1403 = vrot.lane.b32.xlu2 %v1344_v47, %s2923_s26  ;;  %s3511_s26 = sld [smem:[#allocation47_spill]] }
 0x6cc   : > { %2080 = vmatmul.msk.bf16.vlgmr.msrb.gmra.mxu2 %vm953_vm6, %v1344_v47 }
 0x6ce   : > { %v1304_v50 = vpop.f32.mrf.mxu1 }
 0x6d3   : > { %1531 = vrot.lane.b32.xlu2 %v3337_v25, %s2922_s17 }
 0x6db   : > { %1529 = vrot.lane.b32.xlu2 %v1344_v47, %s2922_s17  ;;  %s3513_s17 = sld [smem:[#allocation49_spill]] }
 0x6e3   : > { %1438 = vrot.lane.b32.xlu2 %v3337_v25, %s2927_s3 }
 0x725   : > { %v1404_v51 = vpop.permute.xlu2 %1403 }
 0x726   : > { %2082 = vmatmul.msk.bf16.vlgmr.msrb.gmra.mxu1 %vm953_vm6, %v1404_v51 }
 0x72d   : > { %v1532_v52 = vpop.permute.xlu2 %1531 }
 0x72e   : > { %v1537_v53 = vsel %vm953_vm6, %v1532_v52, 0 }
 0x72f   : > { %1546 = vmatpush.bf16.xpose.msra.mxu1 %v1537_v53 }
 0x735   : > { %v1530_v54 = vpop.permute.xlu2 %1529 }
 0x736   : > { %2086 = vmatmul.msk.bf16.vlgmr.msra.gmra.mxu1 %vm953_vm6, %v1530_v54 }
 0x73d   : > { %v1439_v55 = vpop.permute.xlu2 %1438  ;;  %v1467_v56 = vpop.permute.xlu1 %1466 }
 0x73e   : > { %v1444_v57 = vsel %vm990_vm5, %v1439_v55, 0  ;;  %2084 = vmatmul.msk.bf16.vlgmr.msra.gmra.mxu2 %vm953_vm6, %v1467_v56 }
 0x73f   : > { %1453 = vmatpush.bf16.msrb.mxu3 %v1444_v57 }
 0x74f   : > { %v1361_v58 = vpop.f32.mrf.mxu2 }
 0x750   : > { %v1365_v60 = vmul.f32 0.35355338, %v1361_v58 }
 0x752   : > { %v1366_v61 = vadd.f32 %v1365_v60, %v1343_v59 }
 0x754   : > { %v1367_v62 = vsel %vm953_vm6, %v1366_v61, -inf }
 0x755   : > { %1368 = vmax.xlane.f32.xlu1 %v1367_v62 }
 0x757   : > { %v1363_v63 = vpop.f32.mrf.mxu2 }
 0x76e   : > { %1564 = vrot.lane.b32.xlu1 %v3337_v25, %s2926_s28  ;;  %s3514_s28 = sshll.u32 %s3211_s6, 3 }
 0x76f   : > { %s859_s3 = scalar_lea.vmem [#allocation26], %s3514_s28 }
 0x770   : > { %s1766_s5 = sshll.u32 %s859_s3, 4  ;;  %s1767_s5 = int_to_ptr.vmem [resolvable:$true] %s1766_s5 }
 0x7a3   : > { %v1422_v0 = vpop.f32.mrf.mxu1 }
 0x7a4   : > { %v1426_v1 = vmul.f32 0.35355338, %v1422_v0 }
 0x7a6   : > { %v1427_v2 = vadd.f32 %v1426_v1, %v1343_v59 }
 0x7a8   : > { %v1428_v3 = vsel %vm953_vm6, %v1427_v2, -inf }
 0x7a9   : > { %1429 = vmax.xlane.f32.xlu0 %v1428_v3 }
 0x7ab   : > { %v1424_v4 = vpop.f32.mrf.mxu1 }
 0x7ac   : > { %v2136_v4 = vld [vmem:[#allocation20 + $0x8] sm:$0xff] }
 0x7ad   : > { %1623 = vmatpush.bf16.msrb.mxu2 %v2136_v4 }
 0x7b3   : > { %v1548_v5 = vpop.f32.mrf.mxu1 }
 0x7b4   : > { %v1552_v6 = vmul.f32 0.35355338, %v1548_v5  ;;  %v2135_v5 = vld [vmem:[#allocation20] sm:$0xff] }
 0x7b5   : > { %1624 = vmatpush.bf16.msrb.mxu2 %v2135_v5 }
 0x7b6   : > { %v1553_v7 = vadd.f32 %v1552_v6, %v1343_v59 }
 0x7b8   : > { %v1554_v9 = vsel %vm953_vm6, %v1553_v7, -inf }
 0x7b9   : > { %1555 = vmax.xlane.f32.xlu2 %v1554_v9 }
 0x7bb   : > { %v1550_v10 = vpop.f32.mrf.mxu1 }
 0x7bd   : > { %1378 = vrot.lane.b32.xlu0 %v3337_v25, %s2924_s4 }
 0x7c1   : > { %v1485_v11 = vpop.f32.mrf.mxu2 }
 0x7c2   : > { %v1489_v14 = vmul.f32 0.35355338, %v1485_v11  ;;  %v2345_v11 = vld [vmem:[#allocation21] ss:$0 sm:$0xff] }
 0x7c4   : > { %v1490_v16 = vadd.f32 %v1489_v14, %v1343_v59 }
 0x7c6   : > { %v1491_v17 = vsel %vm953_vm6, %v1490_v16, -inf }
 0x7c8   : > { %v1369_v13 = vpop.xlane.xlu1 %1368 }
 0x7c9   : > { %v1487_v12 = vpop.f32.mrf.mxu2  ;;  %v1370_v18 = vsub.f32 %v1366_v61, %v1369_v13 }
 0x7cb   : > { %v1371_v19 = vmul.f32 1.442695, %v1370_v18 }
 0x7cd   : > { %2372 = vpow2.f32 %v1371_v19 }
 0x7d1   : > { %1501 = vrot.lane.b32.xlu2 %v3337_v25, %s2929_s10 }
 0x7d3   : > { %v2373_v20 = vpop.eup %2372 }
 0x7d4   : > { %v1373_v21 = vsel %vm953_vm6, %v2373_v20, 0.0  ;;  %v1376_v34 = vpack.c.bf16 %v2373_v20, %v2373_v20 }
 0x7e0   : > { %v1565_v30 = vpop.permute.xlu1 %1564 }
 0x7e1   : > { %v1570_v15 = vsel %vm990_vm5, %v1565_v30, 0 }
 0x7e2   : > { %1579 = vmatpush.bf16.msra.mxu3 %v1570_v15 }
 0x7e7   : > { %1492 = vmax.xlane.f32.xlu0 %v1491_v17 }
 0x7fa   : > { %1374 = vadd.xlane.f32.xlu2 %v1373_v21  ;;  %v2138_v21 = vld [vmem:[#allocation23 + $0x8] sm:$0xff] }
 0x81c   : > { %v1430_v22 = vpop.xlane.xlu0 %1429 }
 0x81d   : > { %v1431_v23 = vsub.f32 %v1427_v2, %v1430_v22  ;;  %v2137_v22 = vld [vmem:[#allocation23] sm:$0xff] }
 0x81f   : > { %v1432_v24 = vmul.f32 1.442695, %v1431_v23 }
 0x821   : > { %2374 = vpow2.f32 %v1432_v24 }
 0x827   : > { %v2375_v25 = vpop.eup %2374 }
 0x828   : > { %v1437_v26 = vpack.c.bf16 %v2375_v25, %v2375_v25  ;;  %v1434_v27 = vsel %vm953_vm6, %v2375_v25, 0.0  ;;  %v2141_v25 = vld [vmem:[%s3511_s26 + $0x10] sm:$0xff] }
 0x829   : > { %1435 = vadd.xlane.f32.xlu1 %v1434_v27 }
 0x82a   : > { %2083 = vmatmul.msk.bf16.vlgmr.msrb.gmra.mxu3 %vm953_vm6, %v1437_v26 }
 0x82c   : > { %v1556_v28 = vpop.xlane.xlu2 %1555 }
 0x82d   : > { %v1557_v29 = vsub.f32 %v1553_v7, %v1556_v28 }
 0x82f   : > { %v1558_v31 = vmul.f32 1.442695, %v1557_v29  ;;  %v1379_v32 = vpop.permute.xlu0 %1378 }
 0x830   : > { %v1384_v33 = vsel %vm990_vm5, %v1379_v32, 0 }
 0x831   : > { %2376 = vpow2.f32 %v1558_v31  ;;  %1393 = vmatpush.bf16.msrb.mxu0 %v1384_v33 }
 0x834   : > { %v1502_v35 = vpop.permute.xlu2 %1501  ;;  %2081 = vmatmul.msk.bf16.vlgmr.msrb.gmra.mxu0 %vm953_vm6, %v1376_v34  ;;  %v2346_v34 = vld [vmem:[#allocation6 + $0x4] ss:$0 sm:$0xff] }
 0x835   : > { %v1507_v36 = vsel %vm990_vm5, %v1502_v35, 0 }
 0x836   : > { %1516 = vmatpush.bf16.msra.mxu0 %v1507_v36 }
 0x837   : > { %v2377_v37 = vpop.eup %2376 }
 0x838   : > { %v1563_v38 = vpack.c.bf16 %v2377_v37, %v2377_v37  ;;  %v1560_v46 = vsel %vm953_vm6, %v2377_v37, 0.0 }
 0x83a   : > { %2087 = vmatmul.msk.bf16.vlgmr.msra.gmra.mxu3 %vm953_vm6, %v1563_v38  ;;  %1689 = vmatpush.bf16.msrb.mxu0 %v2138_v21 }
 0x83e   : > { %1690 = vmatpush.bf16.msrb.mxu0 %v2137_v22 }
 0x85a   : > { %v1493_v39 = vpop.xlane.xlu0 %1492 }
 0x85b   : > { %v1494_v41 = vsub.f32 %v1490_v16, %v1493_v39 }
 0x85d   : > { %v1495_v42 = vmul.f32 1.442695, %v1494_v41  ;;  %v2140_v41 = vld [vmem:[%s3511_s26 + $0x8] sm:$0xff] }
 0x85f   : > { %2378 = vpow2.f32 %v1495_v42  ;;  %v2139_v42 = vld [vmem:[%s3511_s26] sm:$0xff] }
 0x865   : > { %v2379_v43 = vpop.eup %2378 }
 0x866   : > { %v1500_v44 = vpack.c.bf16 %v2379_v43, %v2379_v43  ;;  %v1497_v45 = vsel %vm953_vm6, %v2379_v43, 0.0  ;;  %v2348_v43 = vld [vmem:[#allocation24] ss:$0 sm:$0xff] }
 0x867   : > { %1498 = vadd.xlane.f32.xlu0 %v1497_v45 }
 0x868   : > { %2085 = vmatmul.msk.bf16.vlgmr.msra.gmra.mxu0 %vm953_vm6, %v1500_v44 }
 0x86d   : > { %v1375_v48 = vpop.xlane.xlu2 %1374 }
 0x86f   : > { %1561 = vadd.xlane.f32.xlu0 %v1560_v46 }
 0x89c   : > { %v1436_v47 = vpop.xlane.xlu1 %1435 }
 0x89d   : > { %2380 = vrcp.f32 %v1436_v47 }
 0x89e   : > { %2382 = vrcp.f32 %v1375_v48 }
 0x8a3   : > { %v2381_v49 = vpop.eup %2380 }
 0x8a4   : > { %v2383_v52 = vpop.eup %2382 }
 0x8ad   : > { %v1455_v50 = vpop.f32.mrf.mxu3 }
 0x8ae   : > { %v1460_v51 = vmul.f32 %v2381_v49, %v1455_v50 }
 0x8b0   : > { %1462 = vrot.lane.b32.xlu0 %v1460_v51, %s2934_s24  ;;  %s2124_s24 = sshll.u32 %s3060_s23, 3  ;;  %s1754_s23 = scalar_lea.sflag [#allocation5], %s3211_s6 }
 0x8b1   : > { %v1395_v53 = vpop.f32.mrf.mxu0  ;;  %s1764_s4 = scalar_lea.hbm %s3513_s17, %s2124_s24 }
 0x8b2   : > { %v1400_v54 = vmul.f32 %v2383_v52, %v1395_v53  ;;  %s1768_s10 = sshll.u32 %s1764_s4, 4  ;;  %s1769_s10 = int_to_ptr.hbm [resolvable:$true] %s1768_s10 }
 0x8b3   : > { %s2824_s8 = sshra.s32 %s1769_s10, 4  ;;  %s2825_s8 = int_to_ptr.hbm [resolvable:$true] %s2824_s8 }
 0x8b4   : > { %1401 = vst.msk [vmem:[#allocation2] sm:$0xff] %vm953_vm6, %v1400_v54  ;;  %s2826_s29 = scalar_lea.hbm %s2825_s8, 8  ;;  %p2831_p8 = scmp.lt.s32.totalorder %s2825_s8, %s3513_s17 }
 0x8b5   : > { %v1457_v55 = vpop.f32.mrf.mxu3  ;;  %p2827_p1 = scmp.ne.s32.totalorder %s2825_s8, %s2826_s29 }
 0x8b7   : > { %p2828_p4 = pnand %p2827_p1, %p3180_p13 }
 0x8b9   : > { %v1397_v56 = vpop.f32.mrf.mxu0  ;;  %p2829_p12 = pneg %p2828_p4 }
 0x8bd   : > { %v1581_v57 = vpop.f32.mrf.mxu3 }
 0x8c5   : > { %v1583_v58 = vpop.f32.mrf.mxu3 }
 0x8da   : > { %v1499_v59 = vpop.xlane.xlu0 %1498 }
 0x8db   : > { %2384 = vrcp.f32 %v1499_v59 }
 0x8e1   : > { %v2385_v61 = vpop.eup %2384 }
 0x8e2   : > { %v1562_v60 = vpop.xlane.xlu0 %1561 }
 0x8e3   : > { %2386 = vrcp.f32 %v1562_v60 }
 0x8e5   : > { %v1518_v62 = vpop.f32.mrf.mxu0 }
 0x8e6   : > { %v1523_v63 = vmul.f32 %v2385_v61, %v1518_v62 }
 0x8e8   : > { %1525 = vrot.lane.b32.xlu0 %v1523_v63, %s3509_s1  ;;  %s3512_s1 = sld [smem:[#allocation48_spill]] }
 0x8e9   : > { %v2387_v0 = vpop.eup %2386 }
 0x8ea   : > { %v1586_v1 = vmul.f32 %v2387_v0, %v1581_v57 }
 0x8ec   : > { %1588 = vrot.lane.b32.xlu1 %v1586_v1, %s3510_s9 }
 0x8ed   : > { %v1520_v2 = vpop.f32.mrf.mxu0 }
 0x8ee   : > { %v2349_v49 = vld [vmem:[%s3512_s1] ss:$0 sm:$0xff]  ;;  %s2830_s1 = scalar_lea.hbm %s3513_s17, 16 }
 0x8ef   : > { %p2832_p7 = scmp.lt.s32.totalorder %s2830_s1, %s2826_s29 }
 0x8f1   : > { %p2833_p9 = por %p2832_p7, %p2831_p8 }
 0x8f3   : > { %p2834_p10 = pnand %p2833_p9, %p2829_p12 }
 0x922   : > { %v1463_v3 = vpop.permute.xlu0 %1462 }
 0x923   : > { %1465 = vst.msk [vmem:[#allocation2] sm:$0xff] %vm1072_vm7, %v1463_v3 }
 0x95a   : > { %v1526_v6 = vpop.permute.xlu0 %1525 }
 0x95b   : > { %1528 = vst.msk [vmem:[#allocation2] sm:$0xff] %vm1136_vm8, %v1526_v6 }
 0x95e   : > { %v1589_v7 = vpop.permute.xlu1 %1588 }
 0x95f   : > { %1591 = vst.msk [vmem:[#allocation2] sm:$0xff] %vm1200_vm9, %v1589_v7 }
 0x966   : > { %v1592_v9 = vld [vmem:[#allocation2] sm:$0xff] }
 0x967   : > { %v1593_v10 = vpack.c.bf16 %v1592_v9, %v1592_v9 }
 0x969   : > { %2096 = vmatmul.msk.bf16.vlgmr.msrb.gmra.mxu2 %vm877_vm0, %v1593_v10 }
 0x9ec   : > { %v1626_v12 = vpop.f32.mrf.mxu2 }
 0x9ed   : > { %v1627_v13 = vadd.f32 %v2345_v11, %v1626_v12 }
 0x9ef   : > { %v1630_v14 = vadd.f32 %v1627_v13, %v3345_v40  ;;  %v2142_v40 = vld [vmem:[%s3511_s26 + $0x18] sm:$0xff] }
 0x9f0   : > { %1742 = vmatpush.bf16.msrb.mxu1 %v2142_v40 }
 0x9f1   : > { %v1633_v30 = vsel %vm877_vm0, %v1630_v14, 0.0 }
 0x9f2   : > { %1634 = vadd.xlane.f32.xlu0 %v1633_v30 }
 0x9f4   : > { %v1628_v15 = vpop.f32.mrf.mxu2  ;;  %1743 = vmatpush.bf16.msrb.mxu1 %v2141_v25 }
 0x9f8   : > { %1744 = vmatpush.bf16.msrb.mxu1 %v2140_v41 }
 0x9fc   : > { %1745 = vmatpush.bf16.msrb.mxu1 %v2139_v42 }
 0xa65   : > { %v1635_v16 = vpop.xlane.xlu0 %1634 }
 0xa66   : > { %v1636_v17 = vmul.f32 %v1635_v16, %v3260_v8 }
 0xa68   : > { %v1637_v18 = vsub.f32 %v1630_v14, %v1636_v17 }
 0xa6a   : > { %v1638_v19 = vmul.f32 %v1637_v18, %v1637_v18 }
 0xa6c   : > { %v1639_v20 = vsel %vm877_vm0, %v1638_v19, 0.0 }
 0xa6d   : > { %1640 = vadd.xlane.f32.xlu2 %v1639_v20 }
 0xae0   : > { %v1641_v23 = vpop.xlane.xlu2 %1640 }
 0xae1   : > { %v1642_v24 = vmul.f32 %v1641_v23, %v3260_v8  ;;  %v2347_v8 = vld [vmem:[#allocation6 + $0x5] ss:$0 sm:$0xff] }
 0xae3   : > { %v1643_v26 = vadd.f32 1e-05, %v1642_v24 }
 0xae5   : > { %2388 = vrsqrt.f32 %v1643_v26  ;;  %vm1650_vm14 = vweird.f32 %v1643_v26 }
 0xaeb   : > { %v2389_v27 = vpop.eup %2388 }
 0xaec   : > { %v1645_v28 = vmul.f32 %v2389_v27, %v1643_v26  ;;  %vm1651_vm13 = vweird.f32 %v2389_v27 }
 0xaed   : > { %vm1652_vm15 = vmor %vm1650_vm14, %vm1651_vm13 }
 0xaee   : > { %v1646_v29 = vmul.f32 %v2389_v27, %v1645_v28 }
 0xaf0   : > { %v1647_v31 = vmul.f32 0.5, %v1646_v29 }
 0xaf2   : > { %v1648_v32 = vsub.f32 1.5, %v1647_v31 }
 0xaf4   : > { %v1649_v33 = vmul.f32 %v2389_v27, %v1648_v32 }
 0xaf6   : > { %v1653_v35 = vsel %vm1652_vm15, %v2389_v27, %v1649_v33 }
 0xaf7   : > { %v1654_v36 = vmul.f32 %v1653_v35, %v1637_v18 }
 0xaf9   : > { %v1656_v37 = vmul.f32 %v2346_v34, %v1654_v36 }
 0xafb   : > { %v1658_v38 = vadd.f32 %v2347_v8, %v1656_v37 }
 0xafd   : > { %v1659_v39 = vpack.c.bf16 %v1658_v38, %v1658_v38 }
 0xaff   : > { %2105 = vmatmul.msk.bf16.vlgmr.msrb.gmra.mxu0 %vm877_vm0, %v1659_v39 }
 0xb7c   : > { %v1692_v44 = vpop.f32.mrf.mxu0 }
 0xb7d   : > { %v1693_v45 = vadd.f32 %v2348_v43, %v1692_v44 }
 0xb7f   : > { %v1696_v46 = vmax.f32 %v1693_v45, 0.0 }
 0xb81   : > { %v1697_v47 = vpack.c.bf16 %v1696_v46, %v1696_v46 }
 0xb83   : > { %2122 = vmatmul.msk.bf16.vlgmr.msrb.gmra.mxu1 %vm1734_vm1, %v1697_v47 }
 0xb84   : > { %v1694_v48 = vpop.f32.mrf.mxu0 }
 0xc00   : > { %v1747_v50 = vpop.f32.mrf.mxu1 }
 0xc01   : > { %v1748_v51 = vadd.f32 %v2349_v49, %v1747_v50 }
 0xc03   : > { %v1751_v52 = vadd.f32 %v1748_v51, %v1658_v38 }
 0xc05   : > { %1752 = vst.msk [vmem:[%s859_s3] sm:$0xff] %vm877_vm0, %v1751_v52 }
 0xc06   : > { %2837 = shalt.err (!%p2834_p10)
}
 0xc07   : > { %2197 = dma.vmem_to_hbm [thread:$0]  (%p3180_p13), %s1767_s5, 128, %s1769_s10, %s1754_s23  }
 0xc08   : > { %v1749_v53 = vpop.f32.mrf.mxu1 }
 0xc09 PF: > { %s1780_s6 = sand.u32 1, %s2892_s0   ;;  %p3515_p11 = scmp.ge.s32.totalorder %s2904_s21, 2 }
 0xc0a   : > { %s1781_s4 = scalar_lea.sflag [#allocation5], %s1780_s6 }
 0xc0b   : > { %p2244_p0 = pnand %p3515_p11, %p3185_p5 }
 0xc0d   : > { %p2245_p2 = pneg %p2244_p0 }
 0xc0f   : > { %2887 = dma.done.wait (%p2245_p2), %s1781_s4, 128  }
 0xc10   : > { %2889 = vsyncadd (%p2245_p2), %s1781_s4, 4294967168  ;;  %p39_p6 = scmp.ge.s32.totalorder %s3160_s27, 4   ;;  %s3516_s0 = smov %s2896_s30 }
 0xc11   : > { %s3517_s30 = smov %s2900_s20  ;;  %s3518_s20 = smov %s3172_s2 }
 0xc12   : > { %s3519_s21 = smov %s3160_s27  ;;  %41 = sbr.rel (!%p39_p6) target bundleno = 27 (0x1b), region = 202 }
 0xc17   :  { %1787 = vsyncpa [#allocation4], 1 }
 0xc18   :  { %1789 = vsyncpa [#allocation4 + $0x1], 1 }
 0xc19   :  { %1790 = vsyncpa [#allocation7], 1 }
 0xc1a   :  { %1791 = vsyncpa [#allocation10], 1 }
 0xc1b   :  { %1792 = vsyncpa [#allocation13], 1 }
 0xc1c   :  { %1793 = vsyncpa [#allocation16], 1 }
 0xc1d   :  { %1794 = vsyncpa [#allocation19], 1 }
 0xc1e   :  { %1795 = vsyncpa [#allocation22], 1 }
 0xc1f   :  { %1796 = vsyncpa [#allocation25], 1 }
 0xc20   :  { %1797 = vsyncpa [#allocation5], 1 }
 0xc21   :  { %1799 = vsyncpa [#allocation5 + $0x1], 1 }

</bundles_post_ra>
